<compile_context>
chip_gen: v6e
topology: v6e:2x2x1
jax: 0.10.0
libtpu: 0.0.40
codegen_flags: <defaults>
</compile_context>

<pallas_src>
import jax
import jax.numpy as jnp
import numpy as np
from jax.experimental import pallas as pl
from jax.experimental.pallas import tpu as pltpu


def _round_up(x, m):
    return ((x + m - 1) // m) * m


# ----------------------------------------------------------------------------------
# Fused kernel: all shapelet blocks (min-euclidean distances) + LayerNorm + Linear.
# One grid step == one tile of B_TILE batch samples (batch folded onto lanes).
# ----------------------------------------------------------------------------------
def _make_fused_kernel(C, B_TILE, T_pad, L_max, SK, n_classes):
    NW = B_TILE * T_pad  # flat lane width per channel: B_TILE samples x T_pad slots each

    def kernel(x_ref, a_ref, sn_ref, mask_ref, g_ref, bt_ref, w_ref, wb_ref, o_ref):
        # acc[k, b*T_pad + w] = sum_c || x[b, c, w:w+L_k] - s_k[c, :] ||_2
        acc = jnp.zeros((SK, NW), jnp.float32)

        # TODO(synk): for very large C switch this static unroll to
        # lax.fori_loop(..., unroll=True) with dynamic ref indexing.
        for c in range(C):
            xc = x_ref[pl.ds(c, 1), :]                                       # (1, NW)
            # Shared im2col: row l holds x shifted left by l (pltpu.roll == jnp.roll,
            # so shift = NW - l).  Wrap-around only lands in masked columns.
            rows = [xc] + [pltpu.roll(xc, NW - l, axis=1) for l in range(1, L_max)]
            wm = jnp.concatenate(rows, axis=0)                               # (L_max, NW)
            rhs = jnp.concatenate([wm, wm * wm], axis=0)                     # (2*L_max, NW)
            # a_ref[c] = [-2*shapelets_c | prefix-ones]  ->  one MXU dot gives
            #   x_norm_{L(k)}(w) - 2*<s_k, window(w)>   for every stacked shapelet row k.
            comb = jnp.dot(a_ref[c], rhs, preferred_element_type=jnp.float32)  # (SK, NW)
            sq = jnp.maximum(comb + sn_ref[c], 0.0)                          # + ||s_k||^2
            acc = acc + jnp.sqrt(sq)                                         # per-channel L2

        # Hard min over the sliding-window axis, per sample (aligned T_pad lane segments).
        mask = mask_ref[...]                                                 # (SK, T_pad)
        cols = []
        for b in range(B_TILE):
            seg = acc[:, b * T_pad:(b + 1) * T_pad]                          # aligned slice
            cols.append(jnp.min(seg + mask, axis=1, keepdims=True))          # (SK, 1)
        d = jnp.concatenate(cols, axis=1)                                    # (S, B_TILE)

        # --- LayerNorm over shapelet axis (per sample / lane) + Linear head ---
        mean = jnp.mean(d, axis=0, keepdims=True)                            # (1, B_TILE)
        var = jnp.mean((d - mean) ** 2, axis=0, keepdims=True)               # biased (torch LN)
        y = (d - mean) * jax.lax.rsqrt(var + 1e-5)
        y = y * g_ref[...] + bt_ref[...]                                     # (S, B_TILE)
        logits = jnp.dot(w_ref[...], y, preferred_element_type=jnp.float32) + wb_ref[...]
        o_ref[...] = logits[None, :, :]                                      # (1, n_cls, B_TILE)

    return kernel


def shapelet_fused(x_bct, shapelet_blocks, ln_gamma, ln_beta, lin_w_t, lin_b, *, b_tile=None):
    B, C, T = (int(s) for s in x_bct.shape)
    block_dims = tuple((int(s.shape[1]), int(s.shape[2])) for s in shapelet_blocks)
    SK = sum(k for k, _ in block_dims)
    L_max = max(l for _, l in block_dims)
    n_classes = int(lin_w_t.shape[1])
    assert T >= L_max, "time length must cover the longest shapelet"

    # Batch tiling: B_TILE samples per grid step (review: amortize per-step overhead).
    if b_tile is None:
        b_tile = min(_round_up(B, 8), 64)
    B_pad = _round_up(B, b_tile)
    n_grid = B_pad // b_tile
    # T_pad >= T + L_max - 1 so rolled windows never mix samples on valid columns,
    # and a multiple of 128 so per-sample lane segments stay vreg-aligned.
    T_pad = _round_up(max(T + L_max - 1, 128), 128)
    NW = b_tile * T_pad

    # -------- host-side (XLA) prep of static operands --------
    # Stack blocks zero-padded to L_max (zero padding is exact for cross-term and s-norm).
    s_pad = jnp.concatenate(
        [jnp.pad(s.astype(jnp.float32), ((0, 0), (0, 0), (0, L_max - l)))
         for s, (_, l) in zip(shapelet_blocks, block_dims)], axis=1)          # (C, SK, L_max)
    s_norm = jnp.sum(s_pad * s_pad, axis=2, keepdims=True)                    # (C, SK, 1)

    p_np = np.zeros((SK, L_max), np.float32)      # prefix-ones -> per-length x-norm rows
    mask_np = np.zeros((SK, T_pad), np.float32)   # +BIG at invalid window positions
    row = 0
    for (k_i, l_i) in block_dims:
        p_np[row:row + k_i, :l_i] = 1.0
        mask_np[row:row + k_i, T - l_i + 1:] = 1e30
        row += k_i
    p_mat = jnp.broadcast_to(jnp.asarray(p_np)[None], (C, SK, L_max))
    a_mat = jnp.concatenate([-2.0 * s_pad, p_mat], axis=2)                    # (C, SK, 2*L_max)
    mask = jnp.asarray(mask_np)

    # x: (B, C, T) -> zero-pad batch & time -> channel-major flat (C, B_pad*T_pad).
    x_p = jnp.pad(x_bct.astype(jnp.float32), ((0, B_pad - B), (0, 0), (0, T_pad - T)))
    x_flat = jnp.transpose(x_p, (1, 0, 2)).reshape(C, B_pad * T_pad)

    kernel = _make_fused_kernel(C, b_tile, T_pad, L_max, SK, n_classes)

    in_specs = [
        pl.BlockSpec((C, NW), lambda g: (0, g)),                  # per-tile x slab
        pl.BlockSpec((C, SK, 2 * L_max), lambda g: (0, 0, 0)),    # [-2*s | prefix-ones]
        pl.BlockSpec((C, SK, 1), lambda g: (0, 0, 0)),            # shapelet squared norms
        pl.BlockSpec((SK, T_pad), lambda g: (0, 0)),              # window-validity penalty
        pl.BlockSpec((SK, 1), lambda g: (0, 0)),                  # LN gamma (column)
        pl.BlockSpec((SK, 1), lambda g: (0, 0)),                  # LN beta  (column)
        pl.BlockSpec((n_classes, SK), lambda g: (0, 0)),          # Linear W (torch layout)
        pl.BlockSpec((n_classes, 1), lambda g: (0, 0)),           # Linear bias
    ]

    flops = 2 * C * SK * (2 * L_max) * B_pad * T_pad + 2 * SK * n_classes * B_pad
    transcendentals = C * SK * B_pad * T_pad                      # sqrt per (c, k, window)
    bytes_accessed = 4 * (x_flat.size + a_mat.size + s_norm.size + mask.size
                          + 2 * SK + n_classes * (SK + 1) + n_grid * n_classes * b_tile)

    out = pl.pallas_call(
        kernel,
        out_shape=jax.ShapeDtypeStruct((n_grid, n_classes, b_tile), jnp.float32),
        grid=(n_grid,),
        in_specs=in_specs,
        out_specs=pl.BlockSpec((1, n_classes, b_tile), lambda g: (g, 0, 0)),
        compiler_params=pltpu.CompilerParams(
            dimension_semantics=("parallel",),          # independent batch tiles (megacore)
            vmem_limit_bytes=48 * 1024 * 1024,          # explicit; fits v5e/v6e/v7x budgets
        ),
        cost_estimate=pl.CostEstimate(
            flops=int(flops),
            transcendentals=int(transcendentals),
            bytes_accessed=int(bytes_accessed)),
    )(x_flat, a_mat, s_norm, mask,
      ln_gamma.reshape(SK, 1).astype(jnp.float32),
      ln_beta.reshape(SK, 1).astype(jnp.float32),
      jnp.transpose(lin_w_t).astype(jnp.float32),
      lin_b.reshape(n_classes, 1).astype(jnp.float32))

    # (n_grid, n_classes, b_tile) -> (B, n_classes)
    logits = jnp.transpose(out, (0, 2, 1)).reshape(B_pad, n_classes)[:B]
    return logits


# ----------------------------------------------------------------------------------
# Forward (classification / detection path of Shapelet.forward -> predict()).
# ----------------------------------------------------------------------------------
def shapelet_forward(x, p, y, params):
    # TODO(synk): 'onset_detection' path (python loop over history-window prefixes) not
    # implemented; it only re-invokes predict() on prefixes, so the same fused kernel applies.
    del p, y
    B = x.shape[0]
    C = params["in_channels"]
    # x.transpose(2, 1).reshape(B, C, -1)
    x_bct = jnp.swapaxes(x, 1, 2).reshape(B, C, -1).astype(jnp.float32)
    z = shapelet_fused(x_bct, params["shapelet_blocks"], params["ln_gamma"],
                       params["ln_beta"], params["lin_w_t"], params["lin_b"])
    return {"prob": jnp.squeeze(z)}                                           # mirrors .squeeze()


# ----------------------------------------------------------------------------------
# Pure-JAX reference (direct formula) for a correctness sanity check.
# ----------------------------------------------------------------------------------
def reference_forward(x, params):
    B = x.shape[0]
    C = params["in_channels"]
    xb = jnp.swapaxes(x, 1, 2).reshape(B, C, -1).astype(jnp.float32)
    T = xb.shape[-1]
    ds = []
    for s in params["shapelet_blocks"]:
        _, K, L = s.shape
        n_w = T - L + 1
        wins = jnp.stack([xb[:, :, w:w + L] for w in range(n_w)], axis=2)     # (B,C,n_w,L)
        diff = wins[:, :, :, None, :] - s[None, :, None, :, :]                # (B,C,n_w,K,L)
        dist = jnp.sqrt(jnp.sum(diff * diff, axis=-1))                        # (B,C,n_w,K)
        dist = jnp.sum(dist, axis=1)                                          # (B,n_w,K)
        ds.append(jnp.min(dist, axis=1))                                      # (B,K)
    d = jnp.concatenate(ds, axis=1)
    mean = d.mean(-1, keepdims=True)
    var = ((d - mean) ** 2).mean(-1, keepdims=True)
    yn = (d - mean) / jnp.sqrt(var + 1e-5)
    yn = yn * params["ln_gamma"][0] + params["ln_beta"][0]
    z = yn @ params["lin_w_t"] + params["lin_b"][0]
    return jnp.squeeze(z)


if __name__ == "__main__":
    key = jax.random.PRNGKey(0)
    # Small shapes consistent with the module:
    #   window (seq_len) = 16, patch_len = 4 -> n_patches = 4 ; in_channels = 4
    B, n_patches, C, patch_len = 2, 4, 4, 4
    n_classes = 3
    shapelets_size_and_len = {3: 4, 5: 4}        # {shapelet_len: num_shapelets}
    num_shapelets = sum(shapelets_size_and_len.values())

    k_x, k_s, k_w, k_b = jax.random.split(key, 4)
    x = jax.random.normal(k_x, (B, n_patches, C, patch_len), jnp.float32)

    # Deterministic "shapelet" weights (stand-in for the k-means init).
    skeys = jax.random.split(k_s, len(shapelets_size_and_len))
    shapelet_blocks = [
        jax.random.normal(kk, (C, K, L), jnp.float32)
        for kk, (L, K) in zip(skeys, shapelets_size_and_len.items())
    ]

    params = {
        "in_channels": C,
        "shapelet_blocks": shapelet_blocks,
        "ln_gamma": jnp.ones((1, num_shapelets), jnp.float32),
        "ln_beta": jnp.zeros((1, num_shapelets), jnp.float32),
        # torch Linear weight is (n_classes, S); we pass it pre-transposed (S, n_classes).
        "lin_w_t": 0.1 * jax.random.normal(k_w, (num_shapelets, n_classes), jnp.float32),
        "lin_b": 0.1 * jax.random.normal(k_b, (1, n_classes), jnp.float32),
    }

    p_dummy = jnp.zeros((B,), jnp.float32)
    y_dummy = jnp.zeros((B,), jnp.int32)

    out = shapelet_forward(x, p_dummy, y_dummy, params)
    z = jax.block_until_ready(out["prob"])

    ref = np.asarray(reference_forward(x, params))
    assert z.shape == ref.shape, (z.shape, ref.shape)
    assert np.allclose(np.asarray(z), ref, rtol=1e-3, atol=1e-3), "mismatch vs reference"

    print("KERNEL_OK")
</pallas_src>

<mosaic_0001>
module attributes {stable_mosaic.version = 11 : i64} {
  func.func @kernel(%arg0: i32, %arg1: memref<4x1024xf32, #tpu.memory_space<vmem>>, %arg2: memref<4x8x10xf32, #tpu.memory_space<vmem>>, %arg3: memref<4x8x1xf32, #tpu.memory_space<vmem>>, %arg4: memref<8x128xf32, #tpu.memory_space<vmem>>, %arg5: memref<8x1xf32, #tpu.memory_space<vmem>>, %arg6: memref<8x1xf32, #tpu.memory_space<vmem>>, %arg7: memref<3x8xf32, #tpu.memory_space<vmem>>, %arg8: memref<3x1xf32, #tpu.memory_space<vmem>>, %arg9: memref<1x3x8xf32, #tpu.memory_space<vmem>>) attributes {dimension_semantics = [#tpu.dimension_semantics<parallel>], iteration_bounds = array<i64: 1>, scalar_prefetch = 0 : i64, scratch_operands = 0 : i64, tpu.core_type = #tpu.core_type<tc>, window_params = [{transform_indices = @transform_0, window_bounds = array<i64: 4, 1024>}, {pipeline_mode = #tpu.pipeline_mode<synchronous>, transform_indices = @transform_1, window_bounds = array<i64: 4, 8, 10>}, {pipeline_mode = #tpu.pipeline_mode<synchronous>, transform_indices = @transform_2, window_bounds = array<i64: 4, 8, 1>}, {pipeline_mode = #tpu.pipeline_mode<synchronous>, transform_indices = @transform_3, window_bounds = array<i64: 8, 128>}, {pipeline_mode = #tpu.pipeline_mode<synchronous>, transform_indices = @transform_4, window_bounds = array<i64: 8, 1>}, {pipeline_mode = #tpu.pipeline_mode<synchronous>, transform_indices = @transform_5, window_bounds = array<i64: 8, 1>}, {pipeline_mode = #tpu.pipeline_mode<synchronous>, transform_indices = @transform_6, window_bounds = array<i64: 3, 8>}, {pipeline_mode = #tpu.pipeline_mode<synchronous>, transform_indices = @transform_7, window_bounds = array<i64: 3, 1>}, {transform_indices = @transform_8, window_bounds = array<i64: 1, 3, 8>}]} {
    %cst = arith.constant 0.000000e+00 : f32
    %0 = vector.broadcast %cst : f32 to vector<8x1024xf32>
    %c0 = arith.constant 0 : index
    %c0_0 = arith.constant 0 : index
    %1 = vector.load %arg1[%c0, %c0_0] : memref<4x1024xf32, #tpu.memory_space<vmem>>, vector<1x1024xf32>
    %c1023_i32 = arith.constant 1023 : i32
    %2 = tpu.dynamic_rotate %1 by %c1023_i32 dim 1 : vector<1x1024xf32>, i32 -> vector<1x1024xf32>
    %c1022_i32 = arith.constant 1022 : i32
    %3 = tpu.dynamic_rotate %1 by %c1022_i32 dim 1 : vector<1x1024xf32>, i32 -> vector<1x1024xf32>
    %c1021_i32 = arith.constant 1021 : i32
    %4 = tpu.dynamic_rotate %1 by %c1021_i32 dim 1 : vector<1x1024xf32>, i32 -> vector<1x1024xf32>
    %c1020_i32 = arith.constant 1020 : i32
    %5 = tpu.dynamic_rotate %1 by %c1020_i32 dim 1 : vector<1x1024xf32>, i32 -> vector<1x1024xf32>
    %6 = tpu.concatenate %1, %2, %3, %4, %5 in 0 : vector<1x1024xf32>, vector<1x1024xf32>, vector<1x1024xf32>, vector<1x1024xf32>, vector<1x1024xf32> -> vector<5x1024xf32>
    %7 = arith.mulf %6, %6 : vector<5x1024xf32>
    %8 = tpu.concatenate %6, %7 in 0 : vector<5x1024xf32>, vector<5x1024xf32> -> vector<10x1024xf32>
    %c0_1 = arith.constant 0 : index
    %c0_2 = arith.constant 0 : index
    %c0_3 = arith.constant 0 : index
    %9 = vector.load %arg2[%c0_1, %c0_2, %c0_3] : memref<4x8x10xf32, #tpu.memory_space<vmem>>, vector<1x8x10xf32>
    %10 = vector.shape_cast %9 : vector<1x8x10xf32> to vector<8x10xf32>
    %cst_4 = arith.constant dense<0.000000e+00> : vector<8x1024xf32>
    %11 = tpu.matmul %10, %8, %cst_4 {dimension_numbers = #tpu.dot_dimension_numbers<[1], [0], [0], [1], [0, 0, 1, 1], [], []>} : vector<8x10xf32>, vector<10x1024xf32>, vector<8x1024xf32> -> vector<8x1024xf32>
    %c0_5 = arith.constant 0 : index
    %c0_6 = arith.constant 0 : index
    %c0_7 = arith.constant 0 : index
    %12 = vector.load %arg3[%c0_5, %c0_6, %c0_7] : memref<4x8x1xf32, #tpu.memory_space<vmem>>, vector<1x8x1xf32>
    %13 = vector.shape_cast %12 : vector<1x8x1xf32> to vector<8x1xf32>
    %14 = vector.broadcast %13 : vector<8x1xf32> to vector<8x1024xf32>
    %15 = arith.addf %11, %14 : vector<8x1024xf32>
    %cst_8 = arith.constant 0.000000e+00 : f32
    %16 = vector.broadcast %cst_8 : f32 to vector<8x1024xf32>
    %17 = arith.maximumf %15, %16 : vector<8x1024xf32>
    %18 = math.sqrt %17 : vector<8x1024xf32>
    %19 = arith.addf %0, %18 : vector<8x1024xf32>
    %c1 = arith.constant 1 : index
    %c0_9 = arith.constant 0 : index
    %20 = vector.load %arg1[%c1, %c0_9] : memref<4x1024xf32, #tpu.memory_space<vmem>>, vector<1x1024xf32>
    %c1023_i32_10 = arith.constant 1023 : i32
    %21 = tpu.dynamic_rotate %20 by %c1023_i32_10 dim 1 : vector<1x1024xf32>, i32 -> vector<1x1024xf32>
    %c1022_i32_11 = arith.constant 1022 : i32
    %22 = tpu.dynamic_rotate %20 by %c1022_i32_11 dim 1 : vector<1x1024xf32>, i32 -> vector<1x1024xf32>
    %c1021_i32_12 = arith.constant 1021 : i32
    %23 = tpu.dynamic_rotate %20 by %c1021_i32_12 dim 1 : vector<1x1024xf32>, i32 -> vector<1x1024xf32>
    %c1020_i32_13 = arith.constant 1020 : i32
    %24 = tpu.dynamic_rotate %20 by %c1020_i32_13 dim 1 : vector<1x1024xf32>, i32 -> vector<1x1024xf32>
    %25 = tpu.concatenate %20, %21, %22, %23, %24 in 0 : vector<1x1024xf32>, vector<1x1024xf32>, vector<1x1024xf32>, vector<1x1024xf32>, vector<1x1024xf32> -> vector<5x1024xf32>
    %26 = arith.mulf %25, %25 : vector<5x1024xf32>
    %27 = tpu.concatenate %25, %26 in 0 : vector<5x1024xf32>, vector<5x1024xf32> -> vector<10x1024xf32>
    %c1_14 = arith.constant 1 : index
    %c0_15 = arith.constant 0 : index
    %c0_16 = arith.constant 0 : index
    %28 = vector.load %arg2[%c1_14, %c0_15, %c0_16] : memref<4x8x10xf32, #tpu.memory_space<vmem>>, vector<1x8x10xf32>
    %29 = vector.shape_cast %28 : vector<1x8x10xf32> to vector<8x10xf32>
    %cst_17 = arith.constant dense<0.000000e+00> : vector<8x1024xf32>
    %30 = tpu.matmul %29, %27, %cst_17 {dimension_numbers = #tpu.dot_dimension_numbers<[1], [0], [0], [1], [0, 0, 1, 1], [], []>} : vector<8x10xf32>, vector<10x1024xf32>, vector<8x1024xf32> -> vector<8x1024xf32>
    %c1_18 = arith.constant 1 : index
    %c0_19 = arith.constant 0 : index
    %c0_20 = arith.constant 0 : index
    %31 = vector.load %arg3[%c1_18, %c0_19, %c0_20] : memref<4x8x1xf32, #tpu.memory_space<vmem>>, vector<1x8x1xf32>
    %32 = vector.shape_cast %31 : vector<1x8x1xf32> to vector<8x1xf32>
    %33 = vector.broadcast %32 : vector<8x1xf32> to vector<8x1024xf32>
    %34 = arith.addf %30, %33 : vector<8x1024xf32>
    %cst_21 = arith.constant 0.000000e+00 : f32
    %35 = vector.broadcast %cst_21 : f32 to vector<8x1024xf32>
    %36 = arith.maximumf %34, %35 : vector<8x1024xf32>
    %37 = math.sqrt %36 : vector<8x1024xf32>
    %38 = arith.addf %19, %37 : vector<8x1024xf32>
    %c2 = arith.constant 2 : index
    %c0_22 = arith.constant 0 : index
    %39 = vector.load %arg1[%c2, %c0_22] : memref<4x1024xf32, #tpu.memory_space<vmem>>, vector<1x1024xf32>
    %c1023_i32_23 = arith.constant 1023 : i32
    %40 = tpu.dynamic_rotate %39 by %c1023_i32_23 dim 1 : vector<1x1024xf32>, i32 -> vector<1x1024xf32>
    %c1022_i32_24 = arith.constant 1022 : i32
    %41 = tpu.dynamic_rotate %39 by %c1022_i32_24 dim 1 : vector<1x1024xf32>, i32 -> vector<1x1024xf32>
    %c1021_i32_25 = arith.constant 1021 : i32
    %42 = tpu.dynamic_rotate %39 by %c1021_i32_25 dim 1 : vector<1x1024xf32>, i32 -> vector<1x1024xf32>
    %c1020_i32_26 = arith.constant 1020 : i32
    %43 = tpu.dynamic_rotate %39 by %c1020_i32_26 dim 1 : vector<1x1024xf32>, i32 -> vector<1x1024xf32>
    %44 = tpu.concatenate %39, %40, %41, %42, %43 in 0 : vector<1x1024xf32>, vector<1x1024xf32>, vector<1x1024xf32>, vector<1x1024xf32>, vector<1x1024xf32> -> vector<5x1024xf32>
    %45 = arith.mulf %44, %44 : vector<5x1024xf32>
    %46 = tpu.concatenate %44, %45 in 0 : vector<5x1024xf32>, vector<5x1024xf32> -> vector<10x1024xf32>
    %c2_27 = arith.constant 2 : index
    %c0_28 = arith.constant 0 : index
    %c0_29 = arith.constant 0 : index
    %47 = vector.load %arg2[%c2_27, %c0_28, %c0_29] : memref<4x8x10xf32, #tpu.memory_space<vmem>>, vector<1x8x10xf32>
    %48 = vector.shape_cast %47 : vector<1x8x10xf32> to vector<8x10xf32>
    %cst_30 = arith.constant dense<0.000000e+00> : vector<8x1024xf32>
    %49 = tpu.matmul %48, %46, %cst_30 {dimension_numbers = #tpu.dot_dimension_numbers<[1], [0], [0], [1], [0, 0, 1, 1], [], []>} : vector<8x10xf32>, vector<10x1024xf32>, vector<8x1024xf32> -> vector<8x1024xf32>
    %c2_31 = arith.constant 2 : index
    %c0_32 = arith.constant 0 : index
    %c0_33 = arith.constant 0 : index
    %50 = vector.load %arg3[%c2_31, %c0_32, %c0_33] : memref<4x8x1xf32, #tpu.memory_space<vmem>>, vector<1x8x1xf32>
    %51 = vector.shape_cast %50 : vector<1x8x1xf32> to vector<8x1xf32>
    %52 = vector.broadcast %51 : vector<8x1xf32> to vector<8x1024xf32>
    %53 = arith.addf %49, %52 : vector<8x1024xf32>
    %cst_34 = arith.constant 0.000000e+00 : f32
    %54 = vector.broadcast %cst_34 : f32 to vector<8x1024xf32>
    %55 = arith.maximumf %53, %54 : vector<8x1024xf32>
    %56 = math.sqrt %55 : vector<8x1024xf32>
    %57 = arith.addf %38, %56 : vector<8x1024xf32>
    %c3 = arith.constant 3 : index
    %c0_35 = arith.constant 0 : index
    %58 = vector.load %arg1[%c3, %c0_35] : memref<4x1024xf32, #tpu.memory_space<vmem>>, vector<1x1024xf32>
    %c1023_i32_36 = arith.constant 1023 : i32
    %59 = tpu.dynamic_rotate %58 by %c1023_i32_36 dim 1 : vector<1x1024xf32>, i32 -> vector<1x1024xf32>
    %c1022_i32_37 = arith.constant 1022 : i32
    %60 = tpu.dynamic_rotate %58 by %c1022_i32_37 dim 1 : vector<1x1024xf32>, i32 -> vector<1x1024xf32>
    %c1021_i32_38 = arith.constant 1021 : i32
    %61 = tpu.dynamic_rotate %58 by %c1021_i32_38 dim 1 : vector<1x1024xf32>, i32 -> vector<1x1024xf32>
    %c1020_i32_39 = arith.constant 1020 : i32
    %62 = tpu.dynamic_rotate %58 by %c1020_i32_39 dim 1 : vector<1x1024xf32>, i32 -> vector<1x1024xf32>
    %63 = tpu.concatenate %58, %59, %60, %61, %62 in 0 : vector<1x1024xf32>, vector<1x1024xf32>, vector<1x1024xf32>, vector<1x1024xf32>, vector<1x1024xf32> -> vector<5x1024xf32>
    %64 = arith.mulf %63, %63 : vector<5x1024xf32>
    %65 = tpu.concatenate %63, %64 in 0 : vector<5x1024xf32>, vector<5x1024xf32> -> vector<10x1024xf32>
    %c3_40 = arith.constant 3 : index
    %c0_41 = arith.constant 0 : index
    %c0_42 = arith.constant 0 : index
    %66 = vector.load %arg2[%c3_40, %c0_41, %c0_42] : memref<4x8x10xf32, #tpu.memory_space<vmem>>, vector<1x8x10xf32>
    %67 = vector.shape_cast %66 : vector<1x8x10xf32> to vector<8x10xf32>
    %cst_43 = arith.constant dense<0.000000e+00> : vector<8x1024xf32>
    %68 = tpu.matmul %67, %65, %cst_43 {dimension_numbers = #tpu.dot_dimension_numbers<[1], [0], [0], [1], [0, 0, 1, 1], [], []>} : vector<8x10xf32>, vector<10x1024xf32>, vector<8x1024xf32> -> vector<8x1024xf32>
    %c3_44 = arith.constant 3 : index
    %c0_45 = arith.constant 0 : index
    %c0_46 = arith.constant 0 : index
    %69 = vector.load %arg3[%c3_44, %c0_45, %c0_46] : memref<4x8x1xf32, #tpu.memory_space<vmem>>, vector<1x8x1xf32>
    %70 = vector.shape_cast %69 : vector<1x8x1xf32> to vector<8x1xf32>
    %71 = vector.broadcast %70 : vector<8x1xf32> to vector<8x1024xf32>
    %72 = arith.addf %68, %71 : vector<8x1024xf32>
    %cst_47 = arith.constant 0.000000e+00 : f32
    %73 = vector.broadcast %cst_47 : f32 to vector<8x1024xf32>
    %74 = arith.maximumf %72, %73 : vector<8x1024xf32>
    %75 = math.sqrt %74 : vector<8x1024xf32>
    %76 = arith.addf %57, %75 : vector<8x1024xf32>
    %c0_48 = arith.constant 0 : index
    %c0_49 = arith.constant 0 : index
    %77 = vector.load %arg4[%c0_48, %c0_49] : memref<8x128xf32, #tpu.memory_space<vmem>>, vector<8x128xf32>
    %78 = vector.extract_strided_slice %76 {offsets = [0, 0], sizes = [8, 128], strides = [1, 1]} : vector<8x1024xf32> to vector<8x128xf32>
    %79 = arith.addf %78, %77 : vector<8x128xf32>
    %cst_50 = arith.constant dense<0x7F800000> : vector<8xf32>
    %80 = vector.multi_reduction <minimumf>, %79, %cst_50 [1] : vector<8x128xf32> to vector<8xf32>
    %81 = vector.shape_cast %80 : vector<8xf32> to vector<8x1xf32>
    %82 = vector.extract_strided_slice %76 {offsets = [0, 128], sizes = [8, 128], strides = [1, 1]} : vector<8x1024xf32> to vector<8x128xf32>
    %83 = arith.addf %82, %77 : vector<8x128xf32>
    %cst_51 = arith.constant dense<0x7F800000> : vector<8xf32>
    %84 = vector.multi_reduction <minimumf>, %83, %cst_51 [1] : vector<8x128xf32> to vector<8xf32>
    %85 = vector.shape_cast %84 : vector<8xf32> to vector<8x1xf32>
    %86 = vector.extract_strided_slice %76 {offsets = [0, 256], sizes = [8, 128], strides = [1, 1]} : vector<8x1024xf32> to vector<8x128xf32>
    %87 = arith.addf %86, %77 : vector<8x128xf32>
    %cst_52 = arith.constant dense<0x7F800000> : vector<8xf32>
    %88 = vector.multi_reduction <minimumf>, %87, %cst_52 [1] : vector<8x128xf32> to vector<8xf32>
    %89 = vector.shape_cast %88 : vector<8xf32> to vector<8x1xf32>
    %90 = vector.extract_strided_slice %76 {offsets = [0, 384], sizes = [8, 128], strides = [1, 1]} : vector<8x1024xf32> to vector<8x128xf32>
    %91 = arith.addf %90, %77 : vector<8x128xf32>
    %cst_53 = arith.constant dense<0x7F800000> : vector<8xf32>
    %92 = vector.multi_reduction <minimumf>, %91, %cst_53 [1] : vector<8x128xf32> to vector<8xf32>
    %93 = vector.shape_cast %92 : vector<8xf32> to vector<8x1xf32>
    %94 = vector.extract_strided_slice %76 {offsets = [0, 512], sizes = [8, 128], strides = [1, 1]} : vector<8x1024xf32> to vector<8x128xf32>
    %95 = arith.addf %94, %77 : vector<8x128xf32>
    %cst_54 = arith.constant dense<0x7F800000> : vector<8xf32>
    %96 = vector.multi_reduction <minimumf>, %95, %cst_54 [1] : vector<8x128xf32> to vector<8xf32>
    %97 = vector.shape_cast %96 : vector<8xf32> to vector<8x1xf32>
    %98 = vector.extract_strided_slice %76 {offsets = [0, 640], sizes = [8, 128], strides = [1, 1]} : vector<8x1024xf32> to vector<8x128xf32>
    %99 = arith.addf %98, %77 : vector<8x128xf32>
    %cst_55 = arith.constant dense<0x7F800000> : vector<8xf32>
    %100 = vector.multi_reduction <minimumf>, %99, %cst_55 [1] : vector<8x128xf32> to vector<8xf32>
    %101 = vector.shape_cast %100 : vector<8xf32> to vector<8x1xf32>
    %102 = vector.extract_strided_slice %76 {offsets = [0, 768], sizes = [8, 128], strides = [1, 1]} : vector<8x1024xf32> to vector<8x128xf32>
    %103 = arith.addf %102, %77 : vector<8x128xf32>
    %cst_56 = arith.constant dense<0x7F800000> : vector<8xf32>
    %104 = vector.multi_reduction <minimumf>, %103, %cst_56 [1] : vector<8x128xf32> to vector<8xf32>
    %105 = vector.shape_cast %104 : vector<8xf32> to vector<8x1xf32>
    %106 = vector.extract_strided_slice %76 {offsets = [0, 896], sizes = [8, 128], strides = [1, 1]} : vector<8x1024xf32> to vector<8x128xf32>
    %107 = arith.addf %106, %77 : vector<8x128xf32>
    %cst_57 = arith.constant dense<0x7F800000> : vector<8xf32>
    %108 = vector.multi_reduction <minimumf>, %107, %cst_57 [1] : vector<8x128xf32> to vector<8xf32>
    %109 = vector.shape_cast %108 : vector<8xf32> to vector<8x1xf32>
    %110 = tpu.concatenate %81, %85, %89, %93, %97, %101, %105, %109 in 1 : vector<8x1xf32>, vector<8x1xf32>, vector<8x1xf32>, vector<8x1xf32>, vector<8x1xf32>, vector<8x1xf32>, vector<8x1xf32>, vector<8x1xf32> -> vector<8x8xf32>
    %cst_58 = arith.constant dense<0.000000e+00> : vector<8xf32>
    %111 = vector.multi_reduction <add>, %110, %cst_58 [0] : vector<8x8xf32> to vector<8xf32>
    %112 = vector.shape_cast %111 : vector<8xf32> to vector<1x8xf32>
    %cst_59 = arith.constant 8.000000e+00 : f32
    %113 = vector.broadcast %cst_59 : f32 to vector<1x8xf32>
    %114 = arith.divf %112, %113 : vector<1x8xf32>
    %115 = vector.broadcast %114 : vector<1x8xf32> to vector<8x8xf32>
    %116 = arith.subf %110, %115 : vector<8x8xf32>
    %117 = arith.mulf %116, %116 : vector<8x8xf32>
    %cst_60 = arith.constant dense<0.000000e+00> : vector<8xf32>
    %118 = vector.multi_reduction <add>, %117, %cst_60 [0] : vector<8x8xf32> to vector<8xf32>
    %119 = vector.shape_cast %118 : vector<8xf32> to vector<1x8xf32>
    %cst_61 = arith.constant 8.000000e+00 : f32
    %120 = vector.broadcast %cst_61 : f32 to vector<1x8xf32>
    %121 = arith.divf %119, %120 : vector<1x8xf32>
    %122 = vector.broadcast %114 : vector<1x8xf32> to vector<8x8xf32>
    %123 = arith.subf %110, %122 : vector<8x8xf32>
    %cst_62 = arith.constant 9.99999974E-6 : f32
    %124 = vector.broadcast %cst_62 : f32 to vector<1x8xf32>
    %125 = arith.addf %121, %124 : vector<1x8xf32>
    %126 = math.rsqrt %125 : vector<1x8xf32>
    %127 = vector.broadcast %126 : vector<1x8xf32> to vector<8x8xf32>
    %128 = arith.mulf %123, %127 : vector<8x8xf32>
    %c0_63 = arith.constant 0 : index
    %c0_64 = arith.constant 0 : index
    %129 = vector.load %arg5[%c0_63, %c0_64] : memref<8x1xf32, #tpu.memory_space<vmem>>, vector<8x1xf32>
    %130 = vector.broadcast %129 : vector<8x1xf32> to vector<8x8xf32>
    %131 = arith.mulf %128, %130 : vector<8x8xf32>
    %c0_65 = arith.constant 0 : index
    %c0_66 = arith.constant 0 : index
    %132 = vector.load %arg6[%c0_65, %c0_66] : memref<8x1xf32, #tpu.memory_space<vmem>>, vector<8x1xf32>
    %133 = vector.broadcast %132 : vector<8x1xf32> to vector<8x8xf32>
    %134 = arith.addf %131, %133 : vector<8x8xf32>
    %c0_67 = arith.constant 0 : index
    %c0_68 = arith.constant 0 : index
    %135 = vector.load %arg7[%c0_67, %c0_68] : memref<3x8xf32, #tpu.memory_space<vmem>>, vector<3x8xf32>
    %cst_69 = arith.constant dense<0.000000e+00> : vector<3x8xf32>
    %136 = tpu.matmul %135, %134, %cst_69 {dimension_numbers = #tpu.dot_dimension_numbers<[1], [0], [0], [1], [0, 0, 1, 1], [], []>} : vector<3x8xf32>, vector<8x8xf32>, vector<3x8xf32> -> vector<3x8xf32>
    %c0_70 = arith.constant 0 : index
    %c0_71 = arith.constant 0 : index
    %137 = vector.load %arg8[%c0_70, %c0_71] : memref<3x1xf32, #tpu.memory_space<vmem>>, vector<3x1xf32>
    %138 = vector.broadcast %137 : vector<3x1xf32> to vector<3x8xf32>
    %139 = arith.addf %136, %138 : vector<3x8xf32>
    %140 = vector.shape_cast %139 : vector<3x8xf32> to vector<1x3x8xf32>
    %c0_72 = arith.constant 0 : index
    %c0_73 = arith.constant 0 : index
    %c0_74 = arith.constant 0 : index
    %141 = vector.load %arg9[%c0_72, %c0_73, %c0_74] : memref<1x3x8xf32, #tpu.memory_space<vmem>>, vector<1x3x8xf32>
    tpu.vector_store %arg9[%c0_72, %c0_73, %c0_74], %140 {strides = array<i32>} : memref<1x3x8xf32, #tpu.memory_space<vmem>>, vector<1x3x8xf32>,
    return
  }
  func.func @transform_0(%arg0: i32) -> (i32, i32) {
    %c0_i32 = arith.constant 0 : i32
    %c0_i32_0 = arith.constant 0 : i32
    return %c0_i32, %arg0 : i32, i32
  }
  func.func @transform_1(%arg0: i32) -> (i32, i32, i32) {
    %c0_i32 = arith.constant 0 : i32
    %c0_i32_0 = arith.constant 0 : i32
    %c0_i32_1 = arith.constant 0 : i32
    %c0_i32_2 = arith.constant 0 : i32
    return %c0_i32, %c0_i32_0, %c0_i32_1 : i32, i32, i32
  }
  func.func @transform_2(%arg0: i32) -> (i32, i32, i32) {
    %c0_i32 = arith.constant 0 : i32
    %c0_i32_0 = arith.constant 0 : i32
    %c0_i32_1 = arith.constant 0 : i32
    %c0_i32_2 = arith.constant 0 : i32
    return %c0_i32, %c0_i32_0, %c0_i32_1 : i32, i32, i32
  }
  func.func @transform_3(%arg0: i32) -> (i32, i32) {
    %c0_i32 = arith.constant 0 : i32
    %c0_i32_0 = arith.constant 0 : i32
    %c0_i32_1 = arith.constant 0 : i32
    return %c0_i32, %c0_i32_0 : i32, i32
  }
  func.func @transform_4(%arg0: i32) -> (i32, i32) {
    %c0_i32 = arith.constant 0 : i32
    %c0_i32_0 = arith.constant 0 : i32
    %c0_i32_1 = arith.constant 0 : i32
    return %c0_i32, %c0_i32_0 : i32, i32
  }
  func.func @transform_5(%arg0: i32) -> (i32, i32) {
    %c0_i32 = arith.constant 0 : i32
    %c0_i32_0 = arith.constant 0 : i32
    %c0_i32_1 = arith.constant 0 : i32
    return %c0_i32, %c0_i32_0 : i32, i32
  }
  func.func @transform_6(%arg0: i32) -> (i32, i32) {
    %c0_i32 = arith.constant 0 : i32
    %c0_i32_0 = arith.constant 0 : i32
    %c0_i32_1 = arith.constant 0 : i32
    return %c0_i32, %c0_i32_0 : i32, i32
  }
  func.func @transform_7(%arg0: i32) -> (i32, i32) {
    %c0_i32 = arith.constant 0 : i32
    %c0_i32_0 = arith.constant 0 : i32
    %c0_i32_1 = arith.constant 0 : i32
    return %c0_i32, %c0_i32_0 : i32, i32
  }
  func.func @transform_8(%arg0: i32) -> (i32, i32, i32) {
    %c0_i32 = arith.constant 0 : i32
    %c0_i32_0 = arith.constant 0 : i32
    %c0_i32_1 = arith.constant 0 : i32
    return %arg0, %c0_i32, %c0_i32_0 : i32, i32, i32
  }
}

</mosaic_0001>

<bundles_post_ra>
// kernel: tpu_custom_call.1
= control target key start
LH: loop header
LB: loop body
LE: loop exit
PB: predicated region body
PF: predicated region fallthrough
CT: control target
= control target key end

     0   :  { %13 = vsyncpa [#allocation3], 0  ;;  %s3141_s27 = smov [#allocation2]   ;;  %s4794_s0 = inlined_call_operand.vmem [shape: f32[4,1024], index: 0, kind: input, shape index: {}]   ;;  %s4795_s1 = inlined_call_operand.hbm [shape: f32[4,8,10], index: 1, kind: input, shape index: {}]   ;;  %s4796_s2 = inlined_call_operand.vmem [shape: f32[4,8,1], index: 2, kind: input, shape index: {}]   ;;  %s4797_s3 = inlined_call_operand.vmem [shape: f32[8,128], index: 3, kind: input, shape index: {}]   ;;  %s4798_s4 = inlined_call_operand.vmem [shape: f32[8,1], index: 4, kind: input, shape index: {}]   ;;  %s4799_s5 = inlined_call_operand.vmem [shape: f32[8,1], index: 5, kind: input, shape index: {}]   ;;  %s4800_s6 = inlined_call_operand.vmem [shape: f32[3,8], index: 6, kind: input, shape index: {}]   ;;  %s4801_s7 = inlined_call_operand.vmem [shape: f32[3,1], index: 7, kind: input, shape index: {}]   ;;  %s4802_s8 = inlined_call_operand.vmem [shape: f32[1,3,8], index: 8, kind: output, shape index: {}]  }
   0x1   :  { %s21_s28 = sshll.u32 %s3141_s27, 4  ;;  %s22_s28 = int_to_ptr.vmem [resolvable:$true] %s21_s28 }
   0x2   :  { %s3127_s29 = scalar_lea.vmem %s22_s28, 512  ;;  %p3132_p1 = scmp.lt.s32.totalorder %s22_s28, %s22_s28 }
   0x3   :  { %p3128_p0 = scmp.ne.s32.totalorder %s22_s28, %s3127_s29  ;;  %p3133_p2 = scmp.lt.s32.totalorder %s3127_s29, %s3127_s29 }
   0x5   :  { %p3134_p3 = por %p3133_p2, %p3132_p1 }
   0x7   :  { %p3135_p4 = pnand %p3134_p3, %p3128_p0 }
   0x9   :  { %3138 = shalt.err (!%p3135_p4)
}
   0xa   :  { %s3142_s30 = smov 128   ;;  %s3143_s9 = smov 8  }
   0xb   :  { %27 = dma.hbm_to_vmem [thread:$0]  %s4795_s1, 512, %s22_s28, [#allocation3], %s3142_s30, %s3142_s30, %s3143_s9  }
   0xc   :  { %3139 = dma.done.wait [#allocation3], 512  }
   0xd   :  { %3140 = vsyncadd [#allocation3], 4294966784  ;;  %v45_v0 = vlaneseq  ;;  %v43_v5 = vld [vmem:[%s4794_s0] ss:$4 sm:$0xff]  ;;  %s3144_s1 = smov 127   ;;  %s3145_s14 = smov 126  }
   0xe   :  { %s3146_s15 = smov 125   ;;  %s3147_s16 = smov 124   ;;  %v2991_v19 = vld [vmem:[%s4794_s0 + $0x1] ss:$4 sm:$0xff]  ;;  %v3148_v20 = vmov 0.0   ;;  %vm292_vm4 = vcmask 1041408  }
   0xf   :  { %v46_v1 = vshrl.u32 %v45_v0, 7  ;;  %451 = vmatprep.mubr.f32.mxu0 %v3148_v20  ;;  %522 = vmatprep.mubr.f32.mxu1 %v3148_v20  ;;  %v3397_v31 = vld [vmem:[%s4794_s0 + $0x2] ss:$4 sm:$0xff]  ;;  %v3436_v43 = vand.u32 127, %v45_v0  ;;  %vm283_vm5 = vcmask 1040384   ;;  %vm301_vm6 = vcmask 1042432  }
  0x10   :  { %vm310_vm7 = vcmask 1043456   ;;  %vm351_vm8 = vcmask 1044480   ;;  %vm367_vm9 = vcmask 80896  }
  0x11   :  { %v3200_v2 = vsub.s32 1, %v46_v1  ;;  %v3202_v3 = vsub.s32 0, %v46_v1  ;;  %v3204_v4 = vsub.s32 2, %v46_v1  ;;  %v3222_v9 = vsub.s32 3, %v46_v1 }
  0x12   :  { %v3231_v11 = vsub.s32 4, %v46_v1  ;;  %v3252_v13 = vsub.s32 5, %v46_v1  ;;  %v3261_v15 = vsub.s32 6, %v46_v1  ;;  %v3282_v17 = vsub.s32 7, %v46_v1 }
  0x13   :  { %v3210_v6 = vrot.slane %v43_v5, %v3200_v2  ;;  %v3213_v7 = vrot.slane %v43_v5, %v3202_v3  ;;  %v3220_v8 = vrot.slane %v43_v5, %v3204_v4  ;;  %v3229_v10 = vrot.slane %v43_v5, %v3222_v9 }
  0x14   :  { %v3238_v12 = vrot.slane %v43_v5, %v3231_v11  ;;  %v3259_v14 = vrot.slane %v43_v5, %v3252_v13  ;;  %v3268_v16 = vrot.slane %v43_v5, %v3261_v15  ;;  %v3289_v18 = vrot.slane %v43_v5, %v3282_v17 }
  0x15   :  { %87 = vrot.lane.b32.xlu0 %v3210_v6, %s3144_s1  ;;  %85 = vrot.lane.b32.xlu1 %v3213_v7, %s3144_s1  ;;  %v3309_v21 = vrot.slane %v2991_v19, %v3200_v2  ;;  %v3316_v22 = vrot.slane %v2991_v19, %v3204_v4  ;;  %v3323_v23 = vrot.slane %v2991_v19, %v3202_v3  ;;  %vm128_vm0 = vcmp.lt.s32.totalorder %v3436_v43, 126 }
  0x16   :  { %v3330_v24 = vrot.slane %v2991_v19, %v3222_v9  ;;  %v3337_v25 = vrot.slane %v2991_v19, %v3231_v11  ;;  %v3356_v26 = vrot.slane %v2991_v19, %v3252_v13  ;;  %v3363_v27 = vrot.slane %v2991_v19, %v3261_v15 }
  0x17   :  { %v3382_v28 = vrot.slane %v2991_v19, %v3282_v17  ;;  %v3407_v34 = vrot.slane %v3397_v31, %v3200_v2  ;;  %v3419_v37 = vrot.slane %v3397_v31, %v3204_v4  ;;  %v3431_v40 = vrot.slane %v3397_v31, %v3202_v3 }
  0x18   :  { %v3444_v44 = vrot.slane %v3397_v31, %v3222_v9  ;;  %vm103_vm1 = vcmp.lt.s32.totalorder %v3436_v43, 127  ;;  %vm153_vm2 = vcmp.lt.s32.totalorder %v3436_v43, 125  ;;  %v3460_v48 = vrot.slane %v3397_v31, %v3231_v11 }
  0x19   :  { %89 = vrot.lane.b32.xlu0 %v3220_v8, %s3144_s1  ;;  %114 = vrot.lane.b32.xlu1 %v3210_v6, %s3145_s14  ;;  %vm178_vm3 = vcmp.lt.s32.totalorder %v3436_v43, 124 }
  0x1d   :  { %116 = vrot.lane.b32.xlu0 %v3220_v8, %s3145_s14  ;;  %91 = vrot.lane.b32.xlu1 %v3229_v10, %s3144_s1 }
  0x21   :  { %93 = vrot.lane.b32.xlu0 %v3238_v12, %s3144_s1  ;;  %112 = vrot.lane.b32.xlu1 %v3213_v7, %s3145_s14 }
  0x25   :  { %139 = vrot.lane.b32.xlu0 %v3210_v6, %s3146_s15  ;;  %141 = vrot.lane.b32.xlu1 %v3220_v8, %s3146_s15 }
  0x29   :  { %118 = vrot.lane.b32.xlu0 %v3229_v10, %s3145_s14  ;;  %120 = vrot.lane.b32.xlu1 %v3238_v12, %s3145_s14 }
  0x2d   :  { %137 = vrot.lane.b32.xlu0 %v3213_v7, %s3146_s15  ;;  %164 = vrot.lane.b32.xlu1 %v3210_v6, %s3147_s16 }
  0x31   :  { %166 = vrot.lane.b32.xlu0 %v3220_v8, %s3147_s16  ;;  %95 = vrot.lane.b32.xlu1 %v3259_v14, %s3144_s1 }
  0x35   :  { %97 = vrot.lane.b32.xlu0 %v3268_v16, %s3144_s1  ;;  %143 = vrot.lane.b32.xlu1 %v3229_v10, %s3146_s15 }
  0x39   :  { %145 = vrot.lane.b32.xlu0 %v3238_v12, %s3146_s15  ;;  %162 = vrot.lane.b32.xlu1 %v3213_v7, %s3147_s16 }
  0x3d   :  { %122 = vrot.lane.b32.xlu0 %v3259_v14, %s3145_s14  ;;  %124 = vrot.lane.b32.xlu1 %v3268_v16, %s3145_s14 }
  0x41   :  { %168 = vrot.lane.b32.xlu0 %v3229_v10, %s3147_s16  ;;  %170 = vrot.lane.b32.xlu1 %v3238_v12, %s3147_s16 }
  0x45   :  { %99 = vrot.lane.b32.xlu0 %v3289_v18, %s3144_s1  ;;  %147 = vrot.lane.b32.xlu1 %v3259_v14, %s3146_s15 }
  0x49   :  { %149 = vrot.lane.b32.xlu0 %v3268_v16, %s3146_s15  ;;  %126 = vrot.lane.b32.xlu1 %v3289_v18, %s3145_s14 }
  0x4d   :  { %172 = vrot.lane.b32.xlu0 %v3259_v14, %s3147_s16  ;;  %174 = vrot.lane.b32.xlu1 %v3268_v16, %s3147_s16 }
  0x51   :  { %151 = vrot.lane.b32.xlu0 %v3289_v18, %s3146_s15  ;;  %788 = vrot.lane.b32.xlu1 %v3309_v21, %s3144_s1 }
  0x55   :  { %790 = vrot.lane.b32.xlu0 %v3316_v22, %s3144_s1  ;;  %176 = vrot.lane.b32.xlu1 %v3289_v18, %s3147_s16 }
  0x59   :  { %786 = vrot.lane.b32.xlu0 %v3323_v23, %s3144_s1  ;;  %812 = vrot.lane.b32.xlu1 %v3309_v21, %s3145_s14 }
  0x5d   :  { %814 = vrot.lane.b32.xlu0 %v3316_v22, %s3145_s14  ;;  %792 = vrot.lane.b32.xlu1 %v3330_v24, %s3144_s1 }
  0x61   :  { %794 = vrot.lane.b32.xlu0 %v3337_v25, %s3144_s1  ;;  %810 = vrot.lane.b32.xlu1 %v3323_v23, %s3145_s14 }
  0x65   :  { %836 = vrot.lane.b32.xlu0 %v3309_v21, %s3146_s15  ;;  %838 = vrot.lane.b32.xlu1 %v3316_v22, %s3146_s15 }
  0x69   :  { %816 = vrot.lane.b32.xlu0 %v3330_v24, %s3145_s14  ;;  %818 = vrot.lane.b32.xlu1 %v3337_v25, %s3145_s14 }
  0x6d   :  { %834 = vrot.lane.b32.xlu0 %v3323_v23, %s3146_s15  ;;  %860 = vrot.lane.b32.xlu1 %v3309_v21, %s3147_s16 }
  0x71   :  { %862 = vrot.lane.b32.xlu0 %v3316_v22, %s3147_s16  ;;  %796 = vrot.lane.b32.xlu1 %v3356_v26, %s3144_s1 }
  0x75   :  { %798 = vrot.lane.b32.xlu0 %v3363_v27, %s3144_s1  ;;  %840 = vrot.lane.b32.xlu1 %v3330_v24, %s3146_s15 }
  0x79   :  { %842 = vrot.lane.b32.xlu0 %v3337_v25, %s3146_s15  ;;  %858 = vrot.lane.b32.xlu1 %v3323_v23, %s3147_s16 }
  0x7d   :  { %820 = vrot.lane.b32.xlu0 %v3356_v26, %s3145_s14  ;;  %822 = vrot.lane.b32.xlu1 %v3363_v27, %s3145_s14 }
  0x81   :  { %864 = vrot.lane.b32.xlu0 %v3330_v24, %s3147_s16  ;;  %866 = vrot.lane.b32.xlu1 %v3337_v25, %s3147_s16 }
  0x85   :  { %800 = vrot.lane.b32.xlu0 %v3382_v28, %s3144_s1  ;;  %844 = vrot.lane.b32.xlu1 %v3356_v26, %s3146_s15 }
  0x87   :  { %v88_v29 = vpop.permute.xlu0 %87  ;;  %v3388_v30 = vpop.permute.xlu1 %85 }
  0x88   :  { %v110_v60 = vsel %vm103_vm1, %v3388_v30, %v88_v29 }
  0x89   :  { %846 = vrot.lane.b32.xlu0 %v3363_v27, %s3146_s15  ;;  %824 = vrot.lane.b32.xlu1 %v3382_v28, %s3145_s14 }
  0x8b   :  { %v3399_v32 = vpop.permute.xlu0 %89  ;;  %v115_v33 = vpop.permute.xlu1 %114 }
  0x8c   :  { %v109_v47 = vsel %vm103_vm1, %v88_v29, %v3399_v32  ;;  %v195_v29 = vrot.slane %v110_v60, 7 }
  0x8d   :  { %868 = vrot.lane.b32.xlu0 %v3356_v26, %s3147_s16  ;;  %870 = vrot.lane.b32.xlu1 %v3363_v27, %s3147_s16  ;;  %v196_v53 = vrot.slane %v109_v47, 7 }
  0x8f   :  { %v3409_v35 = vpop.permute.xlu0 %116  ;;  %v3411_v36 = vpop.permute.xlu1 %91  ;;  %v285_v58 = vsel %vm283_vm5, %v3210_v6, %v196_v53 }
  0x90   :  { %v134_v49 = vsel %vm128_vm0, %v115_v33, %v3409_v35 }
  0x91   :  { %848 = vrot.lane.b32.xlu0 %v3382_v28, %s3146_s15  ;;  %1479 = vrot.lane.b32.xlu1 %v3407_v34, %s3144_s1  ;;  %v220_v54 = vrot.slane %v134_v49, 6 }
  0x93   :  { %v3421_v38 = vpop.permute.xlu0 %93  ;;  %v3423_v39 = vpop.permute.xlu1 %112  ;;  %v294_v62 = vsel %vm292_vm4, %v285_v58, %v220_v54 }
  0x94   :  { %v135_v63 = vsel %vm128_vm0, %v3423_v39, %v115_v33  ;;  %v107_v58 = vsel %vm103_vm1, %v3411_v36, %v3421_v38 }
  0x95   :  { %1481 = vrot.lane.b32.xlu0 %v3419_v37, %s3144_s1  ;;  %872 = vrot.lane.b32.xlu1 %v3382_v28, %s3147_s16  ;;  %v219_v49 = vrot.slane %v135_v63, 6  ;;  %v198_v63 = vrot.slane %v107_v58, 7 }
  0x97   :  { %v140_v41 = vpop.permute.xlu0 %139  ;;  %v3433_v42 = vpop.permute.xlu1 %141 }
  0x98   :  { %v159_v50 = vsel %vm153_vm2, %v140_v41, %v3433_v42 }
  0x99   :  { %1477 = vrot.lane.b32.xlu0 %v3431_v40, %s3144_s1  ;;  %1503 = vrot.lane.b32.xlu1 %v3407_v34, %s3145_s14  ;;  %v244_v55 = vrot.slane %v159_v50, 5 }
  0x9b   :  { %v119_v45 = vpop.permute.xlu0 %118  ;;  %v3447_v46 = vpop.permute.xlu1 %120  ;;  %v303_v0 = vsel %vm301_vm6, %v294_v62, %v244_v55  ;;  %v284_v55 = vsel %vm283_vm5, %v3213_v7, %v195_v29  ;;  %v3534_v7 = vrot.slane %v3397_v31, %v3252_v13 }
  0x9c   :  { %v133_v60 = vsel %vm128_vm0, %v3409_v35, %v119_v45 }
  0x9d   :  { %1505 = vrot.lane.b32.xlu0 %v3419_v37, %s3145_s14  ;;  %1483 = vrot.lane.b32.xlu1 %v3444_v44, %s3144_s1 }
  0x9f   :  { %v3468_v51 = vpop.permute.xlu0 %137  ;;  %v165_v52 = vpop.permute.xlu1 %164 }
  0xa0   :  { %v160_v1 = vsel %vm153_vm2, %v3468_v51, %v140_v41  ;;  %v108_v41 = vsel %vm103_vm1, %v3399_v32, %v3411_v36  ;;  %v293_v32 = vsel %vm292_vm4, %v284_v55, %v219_v49  ;;  %v221_v49 = vrot.slane %v133_v60, 6 }
  0xa1   :  { %1485 = vrot.lane.b32.xlu0 %v3460_v48, %s3144_s1  ;;  %1501 = vrot.lane.b32.xlu1 %v3431_v40, %s3145_s14  ;;  %v243_v33 = vrot.slane %v160_v1, 5  ;;  %v197_v36 = vrot.slane %v108_v41, 7 }
  0xa3   :  { %v3475_v56 = vpop.permute.xlu0 %166  ;;  %v3477_v57 = vpop.permute.xlu1 %95  ;;  %v302_v62 = vsel %vm301_vm6, %v293_v32, %v243_v33  ;;  %v286_v58 = vsel %vm283_vm5, %v3220_v8, %v197_v36 }
  0xa4   :  { %v184_v59 = vsel %vm178_vm3, %v165_v52, %v3475_v56 }
  0xa5   :  { %v268_v61 = vrot.slane %v184_v59, 4  ;;  %1527 = vrot.lane.b32.xlu0 %v3407_v34, %s3146_s15  ;;  %1529 = vrot.lane.b32.xlu1 %v3419_v37, %s3146_s15 }
  0xa7   :  { %v3499_v5 = vpop.permute.xlu0 %97  ;;  %v144_v6 = vpop.permute.xlu1 %143  ;;  %v312_v19 = vsel %vm310_vm7, %v303_v0, %v268_v61 }
  0xa8   :  { %v320_v47 = vmul.f32 %v312_v19, %v312_v19  ;;  %v158_v35 = vsel %vm153_vm2, %v3433_v42, %v144_v6  ;;  %v3555_v42 = vrot.slane %v3397_v31, %v3261_v15 }
  0xa9   :  { %1507 = vrot.lane.b32.xlu0 %v3444_v44, %s3145_s14  ;;  %1509 = vrot.lane.b32.xlu1 %v3460_v48, %s3145_s14 }
  0xaa   :  { %v336_v50 = vrot.slane %v320_v47, 3 }
  0xab   :  { %v3510_v53 = vpop.permute.xlu0 %145  ;;  %v3512_v54 = vpop.permute.xlu1 %162 }
  0xac   :  { %v185_v59 = vsel %vm178_vm3, %v3512_v54, %v165_v52  ;;  %2979 = vmatprep.subr.msk.mxu0 %vm292_vm4, %v336_v50  ;;  %v132_v52 = vsel %vm128_vm0, %v119_v45, %v3447_v46  ;;  %v157_v0 = vsel %vm153_vm2, %v144_v6, %v3510_v53  ;;  %v245_v45 = vrot.slane %v158_v35, 5 }
  0xad   :  { %v267_v61 = vrot.slane %v185_v59, 4  ;;  %1525 = vrot.lane.b32.xlu0 %v3431_v40, %s3146_s15  ;;  %1551 = vrot.lane.b32.xlu1 %v3407_v34, %s3147_s16  ;;  %v222_v55 = vrot.slane %v132_v52, 6  ;;  %v246_v6 = vrot.slane %v157_v0, 5  ;;  %v287_v59 = vsel %vm283_vm5, %v3229_v10, %v198_v63 }
  0xae   :  { %v353_v10 = vsel %vm351_vm8, %v312_v19, %v336_v50  ;;  %v106_v19 = vsel %vm103_vm1, %v3421_v38, %v3477_v57  ;;  %v105_v50 = vsel %vm103_vm1, %v3477_v57, %v3499_v5 }
  0xaf   :  { %v123_v1 = vpop.permute.xlu0 %122  ;;  %v3546_v29 = vpop.permute.xlu1 %124  ;;  %v311_v47 = vsel %vm310_vm7, %v302_v62, %v267_v61  ;;  %v295_v61 = vsel %vm292_vm4, %v286_v58, %v221_v49  ;;  %v296_v63 = vsel %vm292_vm4, %v287_v59, %v222_v55  ;;  %v199_v59 = vrot.slane %v106_v19, 7 }
  0xb0   :  { %v319_v41 = vmul.f32 %v311_v47, %v311_v47  ;;  %v305_v0 = vsel %vm301_vm6, %v296_v63, %v246_v6  ;;  %v304_v49 = vsel %vm301_vm6, %v295_v61, %v245_v45  ;;  %v131_v38 = vsel %vm128_vm0, %v3447_v46, %v123_v1 }
  0xb1   :  { %1553 = vrot.lane.b32.xlu0 %v3419_v37, %s3147_s16  ;;  %1487 = vrot.lane.b32.xlu1 %v3534_v7, %s3144_s1  ;;  %v130_v6 = vsel %vm128_vm0, %v123_v1, %v3546_v29  ;;  %v223_v1 = vrot.slane %v131_v38, 6  ;;  %v288_v63 = vsel %vm283_vm5, %v3238_v12, %v199_v59  ;;  %v3621_v19 = vrot.slane %v3397_v31, %v3282_v17 }
  0xb2   :  { %v335_v33 = vrot.slane %v319_v41, 3 }
  0xb3   :  { %v169_v32 = vpop.permute.xlu0 %168  ;;  %v171_v60 = vpop.permute.xlu1 %170 }
  0xb4   :  { %v183_v52 = vsel %vm178_vm3, %v3475_v56, %v169_v32  ;;  %v182_v62 = vsel %vm178_vm3, %v169_v32, %v171_v60  ;;  %2980 = vmatpush1.msk.msra.mxu0 %vm292_vm4, %v335_v33  ;;  %v352_v35 = vsel %vm351_vm8, %v311_v47, %v335_v33  ;;  %v3575_v56 = vld [vmem:[#allocation2] sm:$0xff]  ;;  %v200_v32 = vrot.slane %v105_v50, 7 }
  0xb5   :  { %v269_v8 = vrot.slane %v183_v52, 4  ;;  %v270_v36 = vrot.slane %v182_v62, 4  ;;  %1489 = vrot.lane.b32.xlu0 %v3555_v42, %s3144_s1  ;;  %1531 = vrot.lane.b32.xlu1 %v3444_v44, %s3146_s15 }
  0xb6   :  { %417 = vmatprep.subr.mxu0 %v353_v10 }
  0xb7   :  { %418 = vmatpush1.msra.mxu0 %v352_v35  ;;  %v100_v47 = vpop.permute.xlu0 %99  ;;  %v148_v41 = vpop.permute.xlu1 %147  ;;  %v314_v33 = vsel %vm310_vm7, %v305_v0, %v270_v36  ;;  %v313_v58 = vsel %vm310_vm7, %v304_v49, %v269_v8  ;;  %v224_v36 = vrot.slane %v130_v6, 6  ;;  %v289_v0 = vsel %vm283_vm5, %v3259_v14, %v200_v32 }
  0xb8   :  { %v322_v55 = vmul.f32 %v314_v33, %v314_v33  ;;  %2981 = vmatmul.mubr.msk.f32.vlgmr.msra.gmra.mxu0 %vm367_vm9, %v3575_v56  ;;  %v321_v45 = vmul.f32 %v313_v58, %v313_v58  ;;  %v156_v61 = vsel %vm153_vm2, %v3510_v53, %v148_v41  ;;  %v104_v50 = vsel %vm103_vm1, %v3499_v5, %v100_v47 }
  0xb9   :  { %1533 = vrot.lane.b32.xlu0 %v3460_v48, %s3146_s15  ;;  %1549 = vrot.lane.b32.xlu1 %v3431_v40, %s3147_s16  ;;  %v247_v10 = vrot.slane %v156_v61, 5  ;;  %v111_v12 = vsel %vm103_vm1, %v100_v47, %v3388_v30  ;;  %v298_v31 = vsel %vm292_vm4, %v289_v0, %v224_v36  ;;  %v201_v6 = vrot.slane %v104_v50, 7 }
  0xba   :  { %v338_v57 = vrot.slane %v322_v55, 3  ;;  %593 = vmatprep.mubr.f32.mxu0 %v3148_v20  ;;  %v337_v35 = vrot.slane %v321_v45, 3  ;;  %v297_v55 = vsel %vm292_vm4, %v288_v63, %v223_v1 }
  0xbb   :  { %v150_v52 = vpop.permute.xlu0 %149  ;;  %v127_v62 = vpop.permute.xlu1 %126  ;;  %v306_v30 = vsel %vm301_vm6, %v297_v55, %v247_v10 }
  0xbc   :  { %v155_v8 = vsel %vm153_vm2, %v148_v41, %v150_v52  ;;  %2982 = vmatprep.subr.msk.mxu1 %vm292_vm4, %v338_v57  ;;  %v355_v46 = vsel %vm351_vm8, %v314_v33, %v338_v57  ;;  %v354_v41 = vsel %vm351_vm8, %v313_v58, %v337_v35  ;;  %v136_v47 = vsel %vm128_vm0, %v127_v62, %v3423_v39 }
  0xbd   :  { %1511 = vrot.lane.b32.xlu0 %v3534_v7, %s3145_s14  ;;  %1513 = vrot.lane.b32.xlu1 %v3555_v42, %s3145_s14  ;;  %v248_v53 = vrot.slane %v155_v8, 5  ;;  %v202_v57 = vrot.slane %v111_v12, 7  ;;  %v226_v1 = vrot.slane %v136_v47, 6 }
  0xbe   :  { %2983 = vmatpush1.msk.msra.mxu1 %vm292_vm4, %v337_v35 }
  0xbf   :  { %488 = vmatprep.subr.mxu1 %v355_v46  ;;  %v173_v49 = vpop.permute.xlu0 %172  ;;  %v175_v33 = vpop.permute.xlu1 %174  ;;  %v307_v5 = vsel %vm301_vm6, %v298_v31, %v248_v53 }
  0xc0   :  { %v181_v14 = vsel %vm178_vm3, %v171_v60, %v173_v49  ;;  %489 = vmatpush1.msra.mxu1 %v354_v41  ;;  %v180_v58 = vsel %vm178_vm3, %v173_v49, %v175_v33  ;;  %v129_v60 = vsel %vm128_vm0, %v3546_v29, %v127_v62 }
  0xc1   :  { %v271_v45 = vrot.slane %v181_v14, 4  ;;  %v272_v38 = vrot.slane %v180_v58, 4  ;;  %1555 = vrot.lane.b32.xlu0 %v3444_v44, %s3147_s16  ;;  %1557 = vrot.lane.b32.xlu1 %v3460_v48, %s3147_s16  ;;  %v225_v46 = vrot.slane %v129_v60, 6 }
  0xc2   :  { %2984 = vmatmul.mubr.msk.f32.vlgmr.msra.gmra.mxu1 %vm367_vm9, %v3575_v56 }
  0xc3   :  { %v315_v59 = vsel %vm310_vm7, %v306_v30, %v271_v45  ;;  %v316_v32 = vsel %vm310_vm7, %v307_v5, %v272_v38  ;;  %v152_v61 = vpop.permute.xlu0 %151  ;;  %v3651_v35 = vpop.permute.xlu1 %788  ;;  %664 = vmatprep.mubr.f32.mxu1 %v3148_v20 }
  0xc4   :  { %v323_v8 = vmul.f32 %v315_v59, %v315_v59  ;;  %v154_v29 = vsel %vm153_vm2, %v150_v52, %v152_v61  ;;  %v161_v39 = vsel %vm153_vm2, %v152_v61, %v3468_v51  ;;  %v324_v62 = vmul.f32 %v316_v32, %v316_v32 }
  0xc5   :  { %1491 = vrot.lane.b32.xlu0 %v3621_v19, %s3144_s1  ;;  %1535 = vrot.lane.b32.xlu1 %v3534_v7, %s3146_s15  ;;  %v249_v10 = vrot.slane %v154_v29, 5  ;;  %v250_v53 = vrot.slane %v161_v39, 5  ;;  %v290_v52 = vsel %vm283_vm5, %v3268_v16, %v201_v6  ;;  %v291_v51 = vsel %vm283_vm5, %v3289_v18, %v202_v57 }
  0xc6   :  { %v339_v36 = vrot.slane %v323_v8, 3  ;;  %v340_v63 = vrot.slane %v324_v62, 3  ;;  %v299_v14 = vsel %vm292_vm4, %v290_v52, %v225_v46  ;;  %v300_v16 = vsel %vm292_vm4, %v291_v51, %v226_v1 }
  0xc7   :  { %v3665_v0 = vpop.permute.xlu0 %790  ;;  %v177_v49 = vpop.permute.xlu1 %176  ;;  %v308_v18 = vsel %vm301_vm6, %v299_v14, %v249_v10 }
  0xc8   :  { %v179_v41 = vsel %vm178_vm3, %v175_v33, %v177_v49  ;;  %v186_v50 = vsel %vm178_vm3, %v177_v49, %v3512_v54  ;;  %2985 = vmatprep.subr.msk.mxu0 %vm292_vm4, %v340_v63  ;;  %v357_v12 = vsel %vm351_vm8, %v316_v32, %v340_v63  ;;  %v309_v54 = vsel %vm301_vm6, %v300_v16, %v250_v53  ;;  %v3688_v33 = vld [vmem:[%s4794_s0 + $0x3] ss:$4 sm:$0xff] }
  0xc9   :  { %v273_v58 = vrot.slane %v179_v41, 4  ;;  %v274_v55 = vrot.slane %v186_v50, 4  ;;  %1537 = vrot.lane.b32.xlu0 %v3555_v42, %s3146_s15  ;;  %1515 = vrot.lane.b32.xlu1 %v3621_v19, %s3145_s14  ;;  %v356_v30 = vsel %vm351_vm8, %v315_v59, %v339_v36  ;;  %v3701_v6 = vrot.slane %v3688_v33, %v3200_v2 }
  0xca   :  { %2986 = vmatpush1.msk.msra.mxu0 %vm292_vm4, %v339_v36  ;;  %v3718_v2 = vrot.slane %v3688_v33, %v3204_v4  ;;  %v3732_v4 = vrot.slane %v3688_v33, %v3202_v3  ;;  %v3743_v36 = vrot.slane %v3688_v33, %v3222_v9  ;;  %v3757_v53 = vrot.slane %v3688_v33, %v3231_v11 }
  0xcb   :  { %v317_v31 = vsel %vm310_vm7, %v308_v18, %v273_v58  ;;  %v318_v45 = vsel %vm310_vm7, %v309_v54, %v274_v55  ;;  %559 = vmatprep.subr.mxu0 %v357_v12  ;;  %v3692_v38 = vpop.permute.xlu0 %786  ;;  %v813_v5 = vpop.permute.xlu1 %812 }
  0xcc   :  { %v325_v60 = vmul.f32 %v317_v31, %v317_v31  ;;  %560 = vmatpush1.msra.mxu0 %v356_v30  ;;  %v326_v47 = vmul.f32 %v318_v45, %v318_v45  ;;  %v808_v58 = vsel %vm103_vm1, %v3692_v38, %v3651_v35 }
  0xcd   :  { %1559 = vrot.lane.b32.xlu0 %v3534_v7, %s3147_s16  ;;  %1561 = vrot.lane.b32.xlu1 %v3555_v42, %s3147_s16 }
  0xce   :  { %v341_v57 = vrot.slane %v325_v60, 3  ;;  %v342_v32 = vrot.slane %v326_v47, 3  ;;  %2987 = vmatmul.mubr.msk.f32.vlgmr.msra.gmra.mxu0 %vm367_vm9, %v3575_v56  ;;  %v890_v60 = vrot.slane %v808_v58, 7 }
  0xcf   :  { %v3705_v59 = vpop.permute.xlu0 %814  ;;  %v3707_v61 = vpop.permute.xlu1 %792  ;;  %1142 = vmatprep.mubr.f32.mxu0 %v3148_v20 }
  0xd0   :  { %2988 = vmatprep.subr.msk.mxu1 %vm292_vm4, %v342_v32  ;;  %v359_v8 = vsel %vm351_vm8, %v318_v45, %v342_v32  ;;  %v358_v39 = vsel %vm351_vm8, %v317_v31, %v341_v57  ;;  %v831_v9 = vsel %vm128_vm0, %v813_v5, %v3705_v59 }
  0xd1   :  { %1539 = vrot.lane.b32.xlu0 %v3621_v19, %s3146_s15  ;;  %2170 = vrot.lane.b32.xlu1 %v3701_v6, %s3144_s1  ;;  %v915_v41 = vrot.slane %v831_v9, 6 }
  0xd2   :  { %2989 = vmatpush1.msk.msra.mxu1 %vm292_vm4, %v341_v57 }
  0xd3   :  { %630 = vmatprep.subr.mxu1 %v359_v8  ;;  %v3721_v29 = vpop.permute.xlu0 %794  ;;  %v3724_v62 = vpop.permute.xlu1 %810  ;;  %v806_v8 = vsel %vm103_vm1, %v3665_v0, %v3707_v61 }
  0xd4   :  { %631 = vmatpush1.msra.mxu1 %v358_v39  ;;  %v805_v9 = vsel %vm103_vm1, %v3707_v61, %v3721_v29  ;;  %v892_v61 = vrot.slane %v806_v8, 7 }
  0xd5   :  { %2172 = vrot.lane.b32.xlu0 %v3718_v2, %s3144_s1  ;;  %1563 = vrot.lane.b32.xlu1 %v3621_v19, %s3147_s16 }
  0xd6   :  { %2990 = vmatmul.mubr.msk.f32.vlgmr.msra.gmra.mxu1 %vm367_vm9, %v3575_v56  ;;  %v807_v56 = vsel %vm103_vm1, %v3651_v35, %v3665_v0 }
  0xd7   :  { %v837_v46 = vpop.permute.xlu0 %836  ;;  %v839_v1 = vpop.permute.xlu1 %838  ;;  %1213 = vmatprep.mubr.f32.mxu1 %v3148_v20  ;;  %v891_v51 = vrot.slane %v807_v56, 7  ;;  %v978_v56 = vsel %vm283_vm5, %v3323_v23, %v890_v60  ;;  %v3827_v23 = vrot.slane %v3688_v33, %v3252_v13  ;;  %v980_v60 = vsel %vm283_vm5, %v3316_v22, %v892_v61 }
  0xd8   :  { %v855_v63 = vsel %vm153_vm2, %v837_v46, %v839_v1 }
  0xd9   :  { %2168 = vrot.lane.b32.xlu0 %v3732_v4, %s3144_s1  ;;  %2194 = vrot.lane.b32.xlu1 %v3701_v6, %s3145_s14  ;;  %v939_v11 = vrot.slane %v855_v63, 5  ;;  %v979_v14 = vsel %vm283_vm5, %v3309_v21, %v891_v51  ;;  %v832_v21 = vsel %vm128_vm0, %v3724_v62, %v813_v5 }
  0xda   :  { %v987_v55 = vsel %vm292_vm4, %v979_v14, %v915_v41  ;;  %v914_v57 = vrot.slane %v832_v21, 6  ;;  %v893_v14 = vrot.slane %v805_v9, 7 }
  0xdb   :  { %v817_v10 = vpop.permute.xlu0 %816  ;;  %v3745_v3 = vpop.permute.xlu1 %818  ;;  %v995_v54 = vsel %vm301_vm6, %v987_v55, %v939_v11 }
  0xdc   :  { %v986_v0 = vsel %vm292_vm4, %v978_v56, %v914_v57  ;;  %v830_v51 = vsel %vm128_vm0, %v3705_v59, %v817_v10 }
  0xdd   :  { %2196 = vrot.lane.b32.xlu0 %v3718_v2, %s3145_s14  ;;  %2174 = vrot.lane.b32.xlu1 %v3743_v36, %s3144_s1 }
  0xdf   :  { %v3764_v52 = vpop.permute.xlu0 %834  ;;  %v861_v49 = vpop.permute.xlu1 %860 }
  0xe0   :  { %v856_v31 = vsel %vm153_vm2, %v3764_v52, %v837_v46 }
  0xe1   :  { %2176 = vrot.lane.b32.xlu0 %v3757_v53, %s3144_s1  ;;  %2192 = vrot.lane.b32.xlu1 %v3732_v4, %s3145_s14  ;;  %v938_v5 = vrot.slane %v856_v31, 5 }
  0xe3   :  { %v863_v50 = vpop.permute.xlu0 %862  ;;  %v3770_v12 = vpop.permute.xlu1 %796  ;;  %v994_v11 = vsel %vm301_vm6, %v986_v0, %v938_v5 }
  0xe4   :  { %v879_v16 = vsel %vm178_vm3, %v861_v49, %v863_v50 }
  0xe5   :  { %v963_v18 = vrot.slane %v879_v16, 4  ;;  %2218 = vrot.lane.b32.xlu0 %v3701_v6, %s3146_s15  ;;  %2220 = vrot.lane.b32.xlu1 %v3718_v2, %s3146_s15 }
  0xe7   :  { %v1003_v35 = vsel %vm310_vm7, %v995_v54, %v963_v18  ;;  %v3793_v45 = vpop.permute.xlu0 %798  ;;  %v841_v30 = vpop.permute.xlu1 %840  ;;  %v916_v18 = vrot.slane %v830_v51, 6 }
  0xe8   :  { %v1011_v47 = vmul.f32 %v1003_v35, %v1003_v35  ;;  %v854_v59 = vsel %vm153_vm2, %v839_v1, %v841_v30  ;;  %v3847_v1 = vrot.slane %v3688_v33, %v3261_v15 }
  0xe9   :  { %2198 = vrot.lane.b32.xlu0 %v3743_v36, %s3145_s14  ;;  %2200 = vrot.lane.b32.xlu1 %v3757_v53, %s3145_s14  ;;  %v988_v8 = vsel %vm292_vm4, %v980_v60, %v916_v18 }
  0xea   :  { %v1027_v32 = vrot.slane %v1011_v47, 3  ;;  %v981_v47 = vsel %vm283_vm5, %v3330_v24, %v893_v14 }
  0xeb   :  { %v3803_v39 = vpop.permute.xlu0 %842  ;;  %v3805_v46 = vpop.permute.xlu1 %858 }
  0xec   :  { %v880_v63 = vsel %vm178_vm3, %v3805_v46, %v861_v49  ;;  %2993 = vmatprep.subr.msk.mxu0 %vm292_vm4, %v1027_v32  ;;  %v829_v49 = vsel %vm128_vm0, %v817_v10, %v3745_v3  ;;  %v853_v16 = vsel %vm153_vm2, %v841_v30, %v3803_v39  ;;  %v940_v10 = vrot.slane %v854_v59, 5 }
  0xed   :  { %v962_v41 = vrot.slane %v880_v63, 4  ;;  %2216 = vrot.lane.b32.xlu0 %v3732_v4, %s3146_s15  ;;  %2242 = vrot.lane.b32.xlu1 %v3701_v6, %s3147_s16  ;;  %v917_v54 = vrot.slane %v829_v49, 6  ;;  %v941_v31 = vrot.slane %v853_v16, 5  ;;  %v1043_v24 = vsel %vm351_vm8, %v1003_v35, %v1027_v32 }
  0xee   :  { %v996_v51 = vsel %vm301_vm6, %v988_v8, %v940_v10  ;;  %v804_v59 = vsel %vm103_vm1, %v3721_v29, %v3770_v12  ;;  %v803_v35 = vsel %vm103_vm1, %v3770_v12, %v3793_v45 }
  0xef   :  { %v1002_v58 = vsel %vm310_vm7, %v994_v11, %v962_v41  ;;  %v821_v55 = vpop.permute.xlu0 %820  ;;  %v3839_v13 = vpop.permute.xlu1 %822  ;;  %v989_v63 = vsel %vm292_vm4, %v981_v47, %v917_v54  ;;  %v895_v54 = vrot.slane %v803_v35, 7 }
  0xf0   :  { %v1010_v21 = vmul.f32 %v1002_v58, %v1002_v58  ;;  %v997_v41 = vsel %vm301_vm6, %v989_v63, %v941_v31  ;;  %v828_v29 = vsel %vm128_vm0, %v3745_v3, %v821_v55 }
  0xf1   :  { %2244 = vrot.lane.b32.xlu0 %v3718_v2, %s3147_s16  ;;  %2178 = vrot.lane.b32.xlu1 %v3827_v23, %s3144_s1  ;;  %v918_v3 = vrot.slane %v828_v29, 6 }
  0xf2   :  { %v1026_v30 = vrot.slane %v1010_v21, 3  ;;  %v894_v21 = vrot.slane %v804_v59, 7 }
  0xf3   :  { %v865_v57 = vpop.permute.xlu0 %864  ;;  %v867_v5 = vpop.permute.xlu1 %866 }
  0xf4   :  { %v878_v56 = vsel %vm178_vm3, %v863_v50, %v865_v57  ;;  %v877_v15 = vsel %vm178_vm3, %v865_v57, %v867_v5  ;;  %2994 = vmatpush1.msk.msra.mxu0 %vm292_vm4, %v1026_v30  ;;  %v1042_v9 = vsel %vm351_vm8, %v1002_v58, %v1026_v30  ;;  %v3866_v50 = vld [vmem:[#allocation2 + $0x8] sm:$0xff]  ;;  %v827_v58 = vsel %vm128_vm0, %v821_v55, %v3839_v13 }
  0xf5   :  { %v964_v22 = vrot.slane %v878_v56, 4  ;;  %v965_v0 = vrot.slane %v877_v15, 4  ;;  %2180 = vrot.lane.b32.xlu0 %v3847_v1, %s3144_s1  ;;  %2222 = vrot.lane.b32.xlu1 %v3743_v36, %s3146_s15  ;;  %v919_v47 = vrot.slane %v827_v58, 6  ;;  %v983_v56 = vsel %vm283_vm5, %v3356_v26, %v895_v54 }
  0xf6   :  { %1108 = vmatprep.subr.mxu0 %v1043_v24 }
  0xf7   :  { %v1004_v61 = vsel %vm310_vm7, %v996_v51, %v964_v22  ;;  %v1005_v49 = vsel %vm310_vm7, %v997_v41, %v965_v0  ;;  %1109 = vmatpush1.msra.mxu0 %v1042_v9  ;;  %v801_v11 = vpop.permute.xlu0 %800  ;;  %v845_v14 = vpop.permute.xlu1 %844  ;;  %v3912_v22 = vrot.slane %v3688_v33, %v3282_v17  ;;  %v991_v17 = vsel %vm292_vm4, %v983_v56, %v919_v47 }
  0xf8   :  { %v1012_v32 = vmul.f32 %v1004_v61, %v1004_v61  ;;  %v1013_v16 = vmul.f32 %v1005_v49, %v1005_v49  ;;  %2995 = vmatmul.mubr.msk.f32.vlgmr.msra.gmra.mxu0 %vm367_vm9, %v3866_v50  ;;  %v852_v10 = vsel %vm153_vm2, %v3803_v39, %v845_v14  ;;  %v982_v39 = vsel %vm283_vm5, %v3337_v25, %v894_v21 }
  0xf9   :  { %2224 = vrot.lane.b32.xlu0 %v3757_v53, %s3146_s15  ;;  %2240 = vrot.lane.b32.xlu1 %v3732_v4, %s3147_s16  ;;  %v942_v57 = vrot.slane %v852_v10, 5  ;;  %v802_v0 = vsel %vm103_vm1, %v3793_v45, %v801_v11  ;;  %v809_v25 = vsel %vm103_vm1, %v801_v11, %v3692_v38  ;;  %v990_v51 = vsel %vm292_vm4, %v982_v39, %v918_v3 }
  0xfa   :  { %v1028_v12 = vrot.slane %v1012_v32, 3  ;;  %v1029_v18 = vrot.slane %v1013_v16, 3  ;;  %1284 = vmatprep.mubr.f32.mxu0 %v3148_v20  ;;  %v897_v11 = vrot.slane %v809_v25, 7 }
  0xfb   :  { %v847_v31 = vpop.permute.xlu0 %846  ;;  %v825_v30 = vpop.permute.xlu1 %824  ;;  %v998_v38 = vsel %vm301_vm6, %v990_v51, %v942_v57 }
  0xfc   :  { %v851_v60 = vsel %vm153_vm2, %v845_v14, %v847_v31  ;;  %2996 = vmatprep.subr.msk.mxu1 %vm292_vm4, %v1029_v18  ;;  %v1045_v55 = vsel %vm351_vm8, %v1005_v49, %v1029_v18  ;;  %v1044_v9 = vsel %vm351_vm8, %v1004_v61, %v1028_v12  ;;  %v833_v61 = vsel %vm128_vm0, %v825_v30, %v3724_v62 }
  0xfd   :  { %2202 = vrot.lane.b32.xlu0 %v3827_v23, %s3145_s14  ;;  %2204 = vrot.lane.b32.xlu1 %v3847_v1, %s3145_s14  ;;  %v943_v8 = vrot.slane %v851_v60, 5  ;;  %v896_v49 = vrot.slane %v802_v0, 7 }
  0xfe   :  { %2997 = vmatpush1.msk.msra.mxu1 %vm292_vm4, %v1028_v12  ;;  %v921_v12 = vrot.slane %v833_v61, 6 }
  0xff   :  { %1179 = vmatprep.subr.mxu1 %v1045_v55  ;;  %v869_v15 = vpop.permute.xlu0 %868  ;;  %v871_v63 = vpop.permute.xlu1 %870  ;;  %v999_v45 = vsel %vm301_vm6, %v991_v17, %v943_v8 }
 0x100   :  { %v876_v26 = vsel %vm178_vm3, %v867_v5, %v869_v15  ;;  %1180 = vmatpush1.msra.mxu1 %v1044_v9  ;;  %v875_v24 = vsel %vm178_vm3, %v869_v15, %v871_v63  ;;  %v826_v5 = vsel %vm128_vm0, %v3839_v13, %v825_v30  ;;  %v984_v30 = vsel %vm283_vm5, %v3363_v27, %v896_v49 }
 0x101   :  { %v966_v33 = vrot.slane %v876_v26, 4  ;;  %v967_v41 = vrot.slane %v875_v24, 4  ;;  %2246 = vrot.lane.b32.xlu0 %v3743_v36, %s3147_s16  ;;  %2248 = vrot.lane.b32.xlu1 %v3757_v53, %s3147_s16  ;;  %v920_v58 = vrot.slane %v826_v5, 6 }
 0x102   :  { %2998 = vmatmul.mubr.msk.f32.vlgmr.msra.gmra.mxu1 %vm367_vm9, %v3866_v50 }
 0x103   :  { %v1006_v14 = vsel %vm310_vm7, %v998_v38, %v966_v33  ;;  %v1007_v59 = vsel %vm310_vm7, %v999_v45, %v967_v41  ;;  %v849_v35 = vpop.permute.xlu0 %848  ;;  %v3942_v32 = vpop.permute.xlu1 %1479  ;;  %1355 = vmatprep.mubr.f32.mxu1 %v3148_v20  ;;  %v992_v57 = vsel %vm292_vm4, %v984_v30, %v920_v58  ;;  %v3149_v38 = vmov 0   ;;  %v2992_v45 = vld [vmem:[%s4796_s2 + $0x8] sm:$0xff] }
 0x104   :  { %v1014_v16 = vmul.f32 %v1006_v14, %v1006_v14  ;;  %v1015_v13 = vmul.f32 %v1007_v59, %v1007_v59  ;;  %v850_v29 = vsel %vm153_vm2, %v847_v31, %v849_v35  ;;  %v857_v62 = vsel %vm153_vm2, %v849_v35, %v3764_v52  ;;  %3052 = vset.pattern.permute.xlu1 %v3149_v38 }
 0x105   :  { %2182 = vrot.lane.b32.xlu0 %v3912_v22, %s3144_s1  ;;  %2226 = vrot.lane.b32.xlu1 %v3827_v23, %s3146_s15  ;;  %v944_v21 = vrot.slane %v850_v29, 5  ;;  %v945_v54 = vrot.slane %v857_v62, 5  ;;  %v985_v52 = vsel %vm283_vm5, %v3382_v28, %v897_v11  ;;  %v361_v11 = vld [vmem:[%s4796_s2] sm:$0xff] }
 0x106   :  { %v1030_v18 = vrot.slane %v1014_v16, 3  ;;  %v1031_v10 = vrot.slane %v1015_v13, 3  ;;  %v993_v27 = vsel %vm292_vm4, %v985_v52, %v921_v12  ;;  %3051 = vset.pattern.permute.xlu0 %v3149_v38  ;;  %v3020_v16 = vld [vmem:[%s4796_s2 + $0x18] sm:$0xff] }
 0x107   :  { %v3956_v31 = vpop.permute.xlu0 %1481  ;;  %v873_v60 = vpop.permute.xlu1 %872  ;;  %v1000_v28 = vsel %vm301_vm6, %v992_v57, %v944_v21 }
 0x108   :  { %v874_v3 = vsel %vm178_vm3, %v871_v63, %v873_v60  ;;  %v881_v47 = vsel %vm178_vm3, %v873_v60, %v3805_v46  ;;  %2999 = vmatprep.subr.msk.mxu0 %vm292_vm4, %v1031_v10  ;;  %v1047_v55 = vsel %vm351_vm8, %v1007_v59, %v1031_v10  ;;  %v1001_v46 = vsel %vm301_vm6, %v993_v27, %v945_v54 }
 0x109   :  { %v968_v8 = vrot.slane %v874_v3, 4  ;;  %v969_v39 = vrot.slane %v881_v47, 4  ;;  %2228 = vrot.lane.b32.xlu0 %v3847_v1, %s3146_s15  ;;  %2206 = vrot.lane.b32.xlu1 %v3912_v22, %s3145_s14  ;;  %v1046_v63 = vsel %vm351_vm8, %v1006_v14, %v1030_v18  ;;  %v3006_v14 = vld [vmem:[%s4796_s2 + $0x10] sm:$0xff] }
 0x10a   :  { %3000 = vmatpush1.msk.msra.mxu0 %vm292_vm4, %v1030_v18 }
 0x10b   :  { %v1008_v56 = vsel %vm310_vm7, %v1000_v28, %v968_v8  ;;  %v1009_v15 = vsel %vm310_vm7, %v1001_v46, %v969_v39  ;;  %1250 = vmatprep.subr.mxu0 %v1047_v55  ;;  %v3978_v9 = vpop.permute.xlu0 %1477  ;;  %v1504_v0 = vpop.permute.xlu1 %1503 }
 0x10c   :  { %v1016_v25 = vmul.f32 %v1008_v56, %v1008_v56  ;;  %v1017_v26 = vmul.f32 %v1009_v15, %v1009_v15  ;;  %1251 = vmatpush1.msra.mxu0 %v1046_v63  ;;  %v1499_v47 = vsel %vm103_vm1, %v3978_v9, %v3942_v32 }
 0x10d   :  { %2250 = vrot.lane.b32.xlu0 %v3827_v23, %s3147_s16  ;;  %2252 = vrot.lane.b32.xlu1 %v3847_v1, %s3147_s16 }
 0x10e   :  { %v1032_v24 = vrot.slane %v1016_v25, 3  ;;  %v1033_v51 = vrot.slane %v1017_v26, 3  ;;  %3001 = vmatmul.mubr.msk.f32.vlgmr.msra.gmra.mxu0 %vm367_vm9, %v3866_v50 }
 0x10f   :  { %v3987_v17 = vpop.permute.xlu0 %1505  ;;  %v1484_v33 = vpop.permute.xlu1 %1483  ;;  %1833 = vmatprep.mubr.f32.mxu0 %v3148_v20 }
 0x110   :  { %3002 = vmatprep.subr.msk.mxu1 %vm292_vm4, %v1033_v51  ;;  %v1049_v41 = vsel %vm351_vm8, %v1009_v15, %v1033_v51  ;;  %v1048_v61 = vsel %vm351_vm8, %v1008_v56, %v1032_v24  ;;  %v1522_v62 = vsel %vm128_vm0, %v1504_v0, %v3987_v17  ;;  %v1581_v56 = vrot.slane %v1499_v47, 7 }
 0x111   :  { %2230 = vrot.lane.b32.xlu0 %v3912_v22, %s3146_s15  ;;  %2254 = vrot.lane.b32.xlu1 %v3912_v22, %s3147_s16  ;;  %v1606_v54 = vrot.slane %v1522_v62, 6 }
 0x112   :  { %3003 = vmatpush1.msk.msra.mxu1 %vm292_vm4, %v1032_v24  ;;  %v1669_v51 = vsel %vm283_vm5, %v3431_v40, %v1581_v56 }
 0x113   :  { %1321 = vmatprep.subr.mxu1 %v1049_v41  ;;  %v4000_v5 = vpop.permute.xlu0 %1485  ;;  %v4003_v49 = vpop.permute.xlu1 %1501 }
 0x114   :  { %1322 = vmatpush1.msra.mxu1 %v1048_v61  ;;  %v1523_v27 = vsel %vm128_vm0, %v4003_v49, %v1504_v0  ;;  %v1497_v0 = vsel %vm103_vm1, %v3956_v31, %v1484_v33  ;;  %v1496_v41 = vsel %vm103_vm1, %v1484_v33, %v4000_v5 }
 0x115   :  { %3004 = vmatmul.mubr.msk.f32.vlgmr.msra.gmra.mxu1 %vm367_vm9, %v3866_v50  ;;  %1056 = vperm.xlu1 %3052, %v2992_v45   ;;  %v1498_v50 = vsel %vm103_vm1, %v3942_v32, %v3956_v31  ;;  %v1605_v15 = vrot.slane %v1523_v27, 6  ;;  %v1583_v31 = vrot.slane %v1497_v0, 7 }
 0x116   :  { %1904 = vmatprep.mubr.f32.mxu1 %v3148_v20  ;;  %364 = vperm.xlu0 %3051, %v361_v11   ;;  %v1582_v21 = vrot.slane %v1498_v50, 7 }
 0x117   :  { %v1528_v59 = vpop.permute.xlu0 %1527  ;;  %v1530_v35 = vpop.permute.xlu1 %1529  ;;  %v1677_v45 = vsel %vm292_vm4, %v1669_v51, %v1605_v15 }
 0x118   :  { %v1546_v58 = vsel %vm153_vm2, %v1528_v59, %v1530_v35  ;;  %v1670_v52 = vsel %vm283_vm5, %v3407_v34, %v1582_v21 }
 0x119   :  { %1747 = vperm.xlu1 %3052, %v3006_v14   ;;  %v1630_v10 = vrot.slane %v1546_v58, 5  ;;  %v1678_v55 = vsel %vm292_vm4, %v1670_v52, %v1606_v54  ;;  %v1584_v14 = vrot.slane %v1496_v41, 7  ;;  %v1671_v52 = vsel %vm283_vm5, %v3419_v37, %v1583_v31 }
 0x11a   :  { %2438 = vperm.xlu0 %3051, %v3020_v16  }
 0x11b   :  { %v1508_v13 = vpop.permute.xlu0 %1507  ;;  %v4017_v29 = vpop.permute.xlu1 %1509  ;;  %v1686_v8 = vsel %vm301_vm6, %v1678_v55, %v1630_v10 }
 0x11c   :  { %v1521_v11 = vsel %vm128_vm0, %v3987_v17, %v1508_v13  ;;  %v1520_v40 = vsel %vm128_vm0, %v1508_v13, %v4017_v29 }
 0x11d   :  { %v1607_v17 = vrot.slane %v1521_v11, 6  ;;  %v1608_v21 = vrot.slane %v1520_v40, 6 }
 0x11f   :  { %v4028_v12 = vpop.permute.xlu0 %1525  ;;  %v1552_v18 = vpop.permute.xlu1 %1551  ;;  %v1679_v37 = vsel %vm292_vm4, %v1671_v52, %v1607_v17 }
 0x120   :  { %v1547_v34 = vsel %vm153_vm2, %v4028_v12, %v1528_v59 }
 0x121   :  { %v1629_v63 = vrot.slane %v1547_v34, 5  ;;  %v4091_v34 = vld [vmem:[#allocation2 + $0x10] sm:$0xff] }
 0x123   :  { %v1554_v30 = vpop.permute.xlu0 %1553  ;;  %v4030_v60 = vpop.permute.xlu1 %1487  ;;  %v1685_v33 = vsel %vm301_vm6, %v1677_v45, %v1629_v63 }
 0x124   :  { %v1570_v3 = vsel %vm178_vm3, %v1552_v18, %v1554_v30  ;;  %v1495_v0 = vsel %vm103_vm1, %v4000_v5, %v4030_v60 }
 0x125   :  { %v1654_v57 = vrot.slane %v1570_v3, 4  ;;  %v1585_v5 = vrot.slane %v1495_v0, 7 }
 0x127   :  { %v1694_v39 = vsel %vm310_vm7, %v1686_v8, %v1654_v57  ;;  %v4049_v28 = vpop.permute.xlu0 %1489  ;;  %v1532_v46 = vpop.permute.xlu1 %1531 }
 0x128   :  { %v1702_v32 = vmul.f32 %v1694_v39, %v1694_v39  ;;  %v1545_v59 = vsel %vm153_vm2, %v1530_v35, %v1532_v46  ;;  %v1672_v35 = vsel %vm283_vm5, %v3444_v44, %v1584_v14  ;;  %v1494_v51 = vsel %vm103_vm1, %v4030_v60, %v4049_v28 }
 0x129   :  { %v1631_v54 = vrot.slane %v1545_v59, 5  ;;  %v1680_v44 = vsel %vm292_vm4, %v1672_v35, %v1608_v21  ;;  %v1586_v40 = vrot.slane %v1494_v51, 7 }
 0x12a   :  { %v1718_v25 = vrot.slane %v1702_v32, 3 }
 0x12b   :  { %v1534_v26 = vpop.permute.xlu0 %1533  ;;  %v4054_v24 = vpop.permute.xlu1 %1549  ;;  %v1674_v21 = vsel %vm283_vm5, %v3534_v7, %v1586_v40 }
 0x12c   :  { %v1571_v38 = vsel %vm178_vm3, %v4054_v24, %v1552_v18  ;;  %3007 = vmatprep.subr.msk.mxu0 %vm292_vm4, %v1718_v25  ;;  %v1544_v16 = vsel %vm153_vm2, %v1532_v46, %v1534_v26  ;;  %v1734_v27 = vsel %vm351_vm8, %v1694_v39, %v1718_v25 }
 0x12d   :  { %v1653_v61 = vrot.slane %v1571_v38, 4  ;;  %v1632_v10 = vrot.slane %v1544_v16, 5 }
 0x12f   :  { %v1693_v50 = vsel %vm310_vm7, %v1685_v33, %v1653_v61  ;;  %v1512_v62 = vpop.permute.xlu0 %1511  ;;  %v4078_v58 = vpop.permute.xlu1 %1513  ;;  %v1688_v32 = vsel %vm301_vm6, %v1680_v44, %v1632_v10 }
 0x130   :  { %v1701_v18 = vmul.f32 %v1693_v50, %v1693_v50  ;;  %v1519_v45 = vsel %vm128_vm0, %v4017_v29, %v1512_v62  ;;  %v1518_v61 = vsel %vm128_vm0, %v1512_v62, %v4078_v58 }
 0x131   :  { %v1609_v16 = vrot.slane %v1519_v45, 6  ;;  %v1610_v29 = vrot.slane %v1518_v61, 6 }
 0x132   :  { %v1717_v13 = vrot.slane %v1701_v18, 3 }
 0x133   :  { %v1556_v3 = vpop.permute.xlu0 %1555  ;;  %v1558_v47 = vpop.permute.xlu1 %1557 }
 0x134   :  { %v1569_v55 = vsel %vm178_vm3, %v1554_v30, %v1556_v3  ;;  %v1568_v57 = vsel %vm178_vm3, %v1556_v3, %v1558_v47  ;;  %3008 = vmatpush1.msk.msra.mxu0 %vm292_vm4, %v1717_v13  ;;  %v1733_v8 = vsel %vm351_vm8, %v1693_v50, %v1717_v13  ;;  %v1687_v30 = vsel %vm301_vm6, %v1679_v37, %v1631_v54 }
 0x135   :  { %v1655_v46 = vrot.slane %v1569_v55, 4  ;;  %v1656_v56 = vrot.slane %v1568_v57, 4  ;;  %1799 = vmatprep.subr.mxu0 %v1734_v27  ;;  %v1682_v3 = vsel %vm292_vm4, %v1674_v21, %v1610_v29 }
 0x136   :  { %1800 = vmatpush1.msra.mxu0 %v1733_v8 }
 0x137   :  { %v1695_v15 = vsel %vm310_vm7, %v1687_v30, %v1655_v46  ;;  %v1696_v39 = vsel %vm310_vm7, %v1688_v32, %v1656_v56  ;;  %v1492_v63 = vpop.permute.xlu0 %1491  ;;  %v1536_v25 = vpop.permute.xlu1 %1535  ;;  %3009 = vmatmul.mubr.msk.f32.vlgmr.msra.gmra.mxu0 %vm367_vm9, %v4091_v34 }
 0x138   :  { %v1703_v41 = vmul.f32 %v1695_v15, %v1695_v15  ;;  %v1704_v38 = vmul.f32 %v1696_v39, %v1696_v39  ;;  %1975 = vmatprep.mubr.f32.mxu0 %v3148_v20  ;;  %v1543_v33 = vsel %vm153_vm2, %v1534_v26, %v1536_v25  ;;  %v1673_v26 = vsel %vm283_vm5, %v3460_v48, %v1585_v5 }
 0x139   :  { %v1633_v62 = vrot.slane %v1543_v33, 5  ;;  %v1493_v13 = vsel %vm103_vm1, %v4049_v28, %v1492_v63  ;;  %v1500_v52 = vsel %vm103_vm1, %v1492_v63, %v3978_v9  ;;  %v1681_v7 = vsel %vm292_vm4, %v1673_v26, %v1609_v16 }
 0x13a   :  { %v1719_v31 = vrot.slane %v1703_v41, 3  ;;  %v1720_v11 = vrot.slane %v1704_v38, 3  ;;  %v1587_v8 = vrot.slane %v1493_v13, 7  ;;  %v1588_v37 = vrot.slane %v1500_v52, 7 }
 0x13b   :  { %v1538_v60 = vpop.permute.xlu0 %1537  ;;  %v1516_v14 = vpop.permute.xlu1 %1515  ;;  %v1689_v28 = vsel %vm301_vm6, %v1681_v7, %v1633_v62 }
 0x13c   :  { %v1542_v59 = vsel %vm153_vm2, %v1536_v25, %v1538_v60  ;;  %3010 = vmatprep.subr.msk.mxu1 %vm292_vm4, %v1720_v11  ;;  %v1736_v50 = vsel %vm351_vm8, %v1696_v39, %v1720_v11  ;;  %v1735_v17 = vsel %vm351_vm8, %v1695_v15, %v1719_v31  ;;  %v1524_v27 = vsel %vm128_vm0, %v1516_v14, %v4003_v49 }
 0x13d   :  { %3011 = vmatpush1.msk.msra.mxu1 %vm292_vm4, %v1719_v31  ;;  %v1634_v18 = vrot.slane %v1542_v59, 5  ;;  %v1612_v49 = vrot.slane %v1524_v27, 6  ;;  %v1675_v38 = vsel %vm283_vm5, %v3555_v42, %v1587_v8  ;;  %v1676_v31 = vsel %vm283_vm5, %v3621_v19, %v1588_v37 }
 0x13e   :  { %1870 = vmatprep.subr.mxu1 %v1736_v50 }
 0x13f   :  { %v1560_v54 = vpop.permute.xlu0 %1559  ;;  %1871 = vmatpush1.msra.mxu1 %v1735_v17  ;;  %v1562_v10 = vpop.permute.xlu1 %1561  ;;  %v1690_v9 = vsel %vm301_vm6, %v1682_v3, %v1634_v18  ;;  %v1684_v42 = vsel %vm292_vm4, %v1676_v31, %v1612_v49 }
 0x140   :  { %v1567_v35 = vsel %vm178_vm3, %v1558_v47, %v1560_v54  ;;  %v1566_v48 = vsel %vm178_vm3, %v1560_v54, %v1562_v10  ;;  %3012 = vmatmul.mubr.msk.f32.vlgmr.msra.gmra.mxu1 %vm367_vm9, %v4091_v34  ;;  %v1517_v47 = vsel %vm128_vm0, %v4078_v58, %v1516_v14 }
 0x141   :  { %v1657_v55 = vrot.slane %v1567_v35, 4  ;;  %v1658_v57 = vrot.slane %v1566_v48, 4  ;;  %2046 = vmatprep.mubr.f32.mxu1 %v3148_v20  ;;  %v1611_v63 = vrot.slane %v1517_v47, 6 }
 0x143   :  { %v1697_v44 = vsel %vm310_vm7, %v1689_v28, %v1657_v55  ;;  %v1698_v46 = vsel %vm310_vm7, %v1690_v9, %v1658_v57  ;;  %v1540_v56 = vpop.permute.xlu0 %1539  ;;  %v4153_v30 = vpop.permute.xlu1 %2170  ;;  %v1683_v40 = vsel %vm292_vm4, %v1675_v38, %v1611_v63 }
 0x144   :  { %v1705_v32 = vmul.f32 %v1697_v44, %v1697_v44  ;;  %v1706_v15 = vmul.f32 %v1698_v46, %v1698_v46  ;;  %v1541_v39 = vsel %vm153_vm2, %v1538_v60, %v1540_v56  ;;  %v1548_v58 = vsel %vm153_vm2, %v1540_v56, %v4028_v12 }
 0x145   :  { %v1635_v0 = vrot.slane %v1541_v39, 5  ;;  %v1636_v51 = vrot.slane %v1548_v58, 5 }
 0x146   :  { %v1721_v25 = vrot.slane %v1705_v32, 3  ;;  %v1722_v41 = vrot.slane %v1706_v15, 3 }
 0x147   :  { %v4162_v45 = vpop.permute.xlu0 %2172  ;;  %v1564_v61 = vpop.permute.xlu1 %1563  ;;  %v1691_v19 = vsel %vm301_vm6, %v1683_v40, %v1635_v0  ;;  %v1692_v14 = vsel %vm301_vm6, %v1684_v42, %v1636_v51 }
 0x148   :  { %v1565_v11 = vsel %vm178_vm3, %v1562_v10, %v1564_v61  ;;  %v1572_v12 = vsel %vm178_vm3, %v1564_v61, %v4054_v24  ;;  %3013 = vmatprep.subr.msk.mxu0 %vm292_vm4, %v1722_v41  ;;  %v1738_v5 = vsel %vm351_vm8, %v1698_v46, %v1722_v41  ;;  %v1737_v59 = vsel %vm351_vm8, %v1697_v44, %v1721_v25 }
 0x149   :  { %v1659_v33 = vrot.slane %v1565_v11, 4  ;;  %v1660_v60 = vrot.slane %v1572_v12, 4  ;;  %3014 = vmatpush1.msk.msra.mxu0 %vm292_vm4, %v1721_v25  ;;  %v2189_v57 = vsel %vm103_vm1, %v4153_v30, %v4162_v45 }
 0x14a   :  { %1941 = vmatprep.subr.mxu0 %v1738_v5  ;;  %v2273_v27 = vrot.slane %v2189_v57, 7 }
 0x14b   :  { %v1699_v24 = vsel %vm310_vm7, %v1691_v19, %v1659_v33  ;;  %v1700_v16 = vsel %vm310_vm7, %v1692_v14, %v1660_v60  ;;  %v4181_v29 = vpop.permute.xlu0 %2168  ;;  %1942 = vmatpush1.msra.mxu0 %v1737_v59  ;;  %v2195_v50 = vpop.permute.xlu1 %2194 }
 0x14c   :  { %v1707_v62 = vmul.f32 %v1699_v24, %v1699_v24  ;;  %v1708_v18 = vmul.f32 %v1700_v16, %v1700_v16  ;;  %3015 = vmatmul.mubr.msk.f32.vlgmr.msra.gmra.mxu0 %vm367_vm9, %v4091_v34  ;;  %v2361_v56 = vsel %vm283_vm5, %v3701_v6, %v2273_v27  ;;  %v2190_v15 = vsel %vm103_vm1, %v4181_v29, %v4153_v30 }
 0x14d   :  { %2524 = vmatprep.mubr.f32.mxu0 %v3148_v20  ;;  %v2272_v41 = vrot.slane %v2190_v15, 7 }
 0x14e   :  { %v1723_v17 = vrot.slane %v1707_v62, 3  ;;  %v1724_v26 = vrot.slane %v1708_v18, 3 }
 0x14f   :  { %v2197_v21 = vpop.permute.xlu0 %2196  ;;  %v2175_v54 = vpop.permute.xlu1 %2174  ;;  %v2360_v40 = vsel %vm283_vm5, %v3732_v4, %v2272_v41 }
 0x150   :  { %3016 = vmatprep.subr.msk.mxu1 %vm292_vm4, %v1724_v26  ;;  %v1740_v10 = vsel %vm351_vm8, %v1700_v16, %v1724_v26  ;;  %v1739_v13 = vsel %vm351_vm8, %v1699_v24, %v1723_v17  ;;  %v2213_v28 = vsel %vm128_vm0, %v2195_v50, %v2197_v21  ;;  %v2188_v11 = vsel %vm103_vm1, %v4162_v45, %v2175_v54 }
 0x151   :  { %3017 = vmatpush1.msk.msra.mxu1 %vm292_vm4, %v1723_v17  ;;  %v2297_v8 = vrot.slane %v2213_v28, 6  ;;  %v2274_v45 = vrot.slane %v2188_v11, 7 }
 0x152   :  { %2012 = vmatprep.subr.mxu1 %v1740_v10 }
 0x153   :  { %v4190_v52 = vpop.permute.xlu0 %2176  ;;  %2013 = vmatpush1.msra.mxu1 %v1739_v13  ;;  %v4192_v35 = vpop.permute.xlu1 %2192  ;;  %v2369_v39 = vsel %vm292_vm4, %v2361_v56, %v2297_v8 }
 0x154   :  { %3018 = vmatmul.mubr.msk.f32.vlgmr.msra.gmra.mxu1 %vm367_vm9, %v4091_v34  ;;  %v2214_v63 = vsel %vm128_vm0, %v4192_v35, %v2195_v50  ;;  %v2187_v42 = vsel %vm103_vm1, %v2175_v54, %v4190_v52 }
 0x155   :  { %2595 = vmatprep.mubr.f32.mxu1 %v3148_v20  ;;  %v2296_v38 = vrot.slane %v2214_v63, 6  ;;  %v2275_v24 = vrot.slane %v2187_v42, 7 }
 0x157   :  { %v2219_v48 = vpop.permute.xlu0 %2218  ;;  %v2221_v7 = vpop.permute.xlu1 %2220  ;;  %v2368_v60 = vsel %vm292_vm4, %v2360_v40, %v2296_v38  ;;  %v2363_v57 = vsel %vm283_vm5, %v3743_v36, %v2275_v24 }
 0x158   :  { %v2237_v9 = vsel %vm153_vm2, %v2219_v48, %v2221_v7 }
 0x159   :  { %v2321_v37 = vrot.slane %v2237_v9, 5 }
 0x15b   :  { %v2199_v3 = vpop.permute.xlu0 %2198  ;;  %v4197_v55 = vpop.permute.xlu1 %2200  ;;  %v2377_v49 = vsel %vm301_vm6, %v2369_v39, %v2321_v37  ;;  %v4267_v37 = vld [vmem:[#allocation2 + $0x18] sm:$0xff] }
 0x15c   :  { %v2212_v14 = vsel %vm128_vm0, %v2197_v21, %v2199_v3  ;;  %v2211_v4 = vsel %vm128_vm0, %v2199_v3, %v4197_v55  ;;  %v2362_v3 = vsel %vm283_vm5, %v3718_v2, %v2274_v45 }
 0x15d   :  { %v2298_v54 = vrot.slane %v2212_v14, 6  ;;  %v2299_v21 = vrot.slane %v2211_v4, 6 }
 0x15f   :  { %v4207_v47 = vpop.permute.xlu0 %2216  ;;  %v2243_v34 = vpop.permute.xlu1 %2242  ;;  %v2370_v2 = vsel %vm292_vm4, %v2362_v3, %v2298_v54  ;;  %v2371_v36 = vsel %vm292_vm4, %v2363_v57, %v2299_v21 }
 0x160   :  { %v2238_v6 = vsel %vm153_vm2, %v4207_v47, %v2219_v48 }
 0x161   :  { %v2320_v61 = vrot.slane %v2238_v6, 5 }
 0x163   :  { %v2245_v44 = vpop.permute.xlu0 %2244  ;;  %v4209_v46 = vpop.permute.xlu1 %2178  ;;  %v2376_v59 = vsel %vm301_vm6, %v2368_v60, %v2320_v61 }
 0x164   :  { %v2261_v32 = vsel %vm178_vm3, %v2243_v34, %v2245_v44  ;;  %v2186_v6 = vsel %vm103_vm1, %v4190_v52, %v4209_v46 }
 0x165   :  { %v2345_v58 = vrot.slane %v2261_v32, 4  ;;  %v2276_v11 = vrot.slane %v2186_v6, 7 }
 0x167   :  { %v2385_v25 = vsel %vm310_vm7, %v2377_v49, %v2345_v58  ;;  %v4228_v0 = vpop.permute.xlu0 %2180  ;;  %v2223_v51 = vpop.permute.xlu1 %2222 }
 0x168   :  { %v2393_v30 = vmul.f32 %v2385_v25, %v2385_v25  ;;  %v2236_v16 = vsel %vm153_vm2, %v2221_v7, %v2223_v51  ;;  %v2185_v41 = vsel %vm103_vm1, %v4209_v46, %v4228_v0 }
 0x169   :  { %v2322_v10 = vrot.slane %v2236_v16, 5 }
 0x16a   :  { %v2409_v31 = vrot.slane %v2393_v30, 3 }
 0x16b   :  { %v2225_v12 = vpop.permute.xlu0 %2224  ;;  %v4233_v5 = vpop.permute.xlu1 %2240 }
 0x16c   :  { %v2262_v33 = vsel %vm178_vm3, %v4233_v5, %v2243_v34  ;;  %3021 = vmatprep.subr.msk.mxu0 %vm292_vm4, %v2409_v31  ;;  %v2235_v50 = vsel %vm153_vm2, %v2223_v51, %v2225_v12  ;;  %v2425_v27 = vsel %vm351_vm8, %v2385_v25, %v2409_v31 }
 0x16d   :  { %v2344_v19 = vrot.slane %v2262_v33, 4  ;;  %v2323_v13 = vrot.slane %v2235_v50, 5 }
 0x16f   :  { %v2384_v62 = vsel %vm310_vm7, %v2376_v59, %v2344_v19  ;;  %v2203_v18 = vpop.permute.xlu0 %2202  ;;  %v2205_v17 = vpop.permute.xlu1 %2204  ;;  %v2379_v15 = vsel %vm301_vm6, %v2371_v36, %v2323_v13 }
 0x170   :  { %v2392_v26 = vmul.f32 %v2384_v62, %v2384_v62  ;;  %v2210_v30 = vsel %vm128_vm0, %v4197_v55, %v2203_v18  ;;  %v2209_v38 = vsel %vm128_vm0, %v2203_v18, %v2205_v17  ;;  %v2277_v55 = vrot.slane %v2185_v41, 7 }
 0x171   :  { %v2300_v45 = vrot.slane %v2210_v30, 6 }
 0x172   :  { %v2408_v48 = vrot.slane %v2392_v26, 3  ;;  %v2365_v26 = vsel %vm283_vm5, %v3827_v23, %v2277_v55 }
 0x173   :  { %v2247_v7 = vpop.permute.xlu0 %2246  ;;  %v2249_v28 = vpop.permute.xlu1 %2248 }
 0x174   :  { %v2260_v9 = vsel %vm178_vm3, %v2245_v44, %v2247_v7  ;;  %v2259_v34 = vsel %vm178_vm3, %v2247_v7, %v2249_v28  ;;  %3022 = vmatpush1.msk.msra.mxu0 %vm292_vm4, %v2408_v48  ;;  %v2424_v8 = vsel %vm351_vm8, %v2384_v62, %v2408_v48  ;;  %v2378_v44 = vsel %vm301_vm6, %v2370_v2, %v2322_v10 }
 0x175   :  { %v2346_v56 = vrot.slane %v2260_v9, 4  ;;  %v2347_v32 = vrot.slane %v2259_v34, 4  ;;  %2490 = vmatprep.subr.mxu0 %v2425_v27 }
 0x176   :  { %2491 = vmatpush1.msra.mxu0 %v2424_v8 }
 0x177   :  { %v2386_v39 = vsel %vm310_vm7, %v2378_v44, %v2346_v56  ;;  %v2387_v58 = vsel %vm310_vm7, %v2379_v15, %v2347_v32  ;;  %v2183_v63 = vpop.permute.xlu0 %2182  ;;  %3023 = vmatmul.mubr.msk.f32.vlgmr.msra.gmra.mxu0 %vm367_vm9, %v4267_v37  ;;  %v2227_v49 = vpop.permute.xlu1 %2226 }
 0x178   :  { %v2394_v25 = vmul.f32 %v2386_v39, %v2386_v39  ;;  %v2395_v51 = vmul.f32 %v2387_v58, %v2387_v58  ;;  %2666 = vmatprep.mubr.f32.mxu0 %v3148_v20  ;;  %v2184_v52 = vsel %vm103_vm1, %v4228_v0, %v2183_v63  ;;  %v2191_v40 = vsel %vm103_vm1, %v2183_v63, %v4181_v29 }
 0x179   :  { %v2234_v46 = vsel %vm153_vm2, %v2225_v12, %v2227_v49  ;;  %v2301_v29 = vrot.slane %v2209_v38, 6  ;;  %v2278_v14 = vrot.slane %v2184_v52, 7  ;;  %v2279_v4 = vrot.slane %v2191_v40, 7  ;;  %v453_v40 = vpop.f32.mrf.mxu0 }
 0x17a   :  { %v2410_v61 = vrot.slane %v2394_v25, 3  ;;  %v2411_v31 = vrot.slane %v2395_v51, 3  ;;  %v2324_v59 = vrot.slane %v2234_v46, 5 }
 0x17b   :  { %v2229_v42 = vpop.permute.xlu0 %2228  ;;  %v2207_v33 = vpop.permute.xlu1 %2206  ;;  %v2373_v13 = vsel %vm292_vm4, %v2365_v26, %v2301_v29  ;;  %v2367_v23 = vsel %vm283_vm5, %v3912_v22, %v2279_v4 }
 0x17c   :  { %v2233_v60 = vsel %vm153_vm2, %v2227_v49, %v2229_v42  ;;  %v2208_v19 = vsel %vm128_vm0, %v2205_v17, %v2207_v33  ;;  %v2215_v0 = vsel %vm128_vm0, %v2207_v33, %v4192_v35  ;;  %3024 = vmatprep.subr.msk.mxu1 %vm292_vm4, %v2411_v31  ;;  %v2427_v12 = vsel %vm351_vm8, %v2387_v58, %v2411_v31  ;;  %v455_v55 = vpop.f32.mrf.mxu0 }
 0x17d   :  { %3025 = vmatpush1.msk.msra.mxu1 %vm292_vm4, %v2410_v61  ;;  %v2325_v24 = vrot.slane %v2233_v60, 5  ;;  %v2426_v16 = vsel %vm351_vm8, %v2386_v39, %v2410_v61  ;;  %v2302_v50 = vrot.slane %v2208_v19, 6  ;;  %v2303_v62 = vrot.slane %v2215_v0, 6 }
 0x17e   :  { %2561 = vmatprep.subr.mxu1 %v2427_v12  ;;  %v2364_v17 = vsel %vm283_vm5, %v3757_v53, %v2276_v11  ;;  %v2366_v53 = vsel %vm283_vm5, %v3847_v1, %v2278_v14 }
 0x17f   :  { %v2251_v18 = vpop.permute.xlu0 %2250  ;;  %2562 = vmatpush1.msra.mxu1 %v2426_v16  ;;  %v2253_v35 = vpop.permute.xlu1 %2252  ;;  %v2372_v10 = vsel %vm292_vm4, %v2364_v17, %v2300_v45  ;;  %v2381_v7 = vsel %vm301_vm6, %v2373_v13, %v2325_v24  ;;  %v2375_v9 = vsel %vm292_vm4, %v2367_v23, %v2303_v62 }
 0x180   :  { %v2258_v54 = vsel %vm178_vm3, %v2249_v28, %v2251_v18  ;;  %v2257_v21 = vsel %vm178_vm3, %v2251_v18, %v2253_v35  ;;  %3026 = vmatmul.mubr.msk.f32.vlgmr.msra.gmra.mxu1 %vm367_vm9, %v4267_v37  ;;  %v2380_v57 = vsel %vm301_vm6, %v2372_v10, %v2324_v59  ;;  %v2374_v28 = vsel %vm292_vm4, %v2366_v53, %v2302_v50 }
 0x181   :  { %v2348_v48 = vrot.slane %v2258_v54, 4  ;;  %v2349_v3 = vrot.slane %v2257_v21, 4  ;;  %2737 = vmatprep.mubr.f32.mxu1 %v3148_v20 }
 0x183   :  { %v2388_v34 = vsel %vm310_vm7, %v2380_v57, %v2348_v48  ;;  %v2389_v27 = vsel %vm310_vm7, %v2381_v7, %v2349_v3  ;;  %v2231_v8 = vpop.permute.xlu0 %2230  ;;  %v2255_v2 = vpop.permute.xlu1 %2254 }
 0x184   :  { %v2396_v36 = vmul.f32 %v2388_v34, %v2388_v34  ;;  %v2397_v56 = vmul.f32 %v2389_v27, %v2389_v27  ;;  %v2232_v1 = vsel %vm153_vm2, %v2229_v42, %v2231_v8  ;;  %v2239_v22 = vsel %vm153_vm2, %v2231_v8, %v4207_v47  ;;  %v524_v42 = vpop.f32.mrf.mxu1 }
 0x185   :  { %v2326_v32 = vrot.slane %v2232_v1, 5  ;;  %v2327_v44 = vrot.slane %v2239_v22, 5  ;;  %v2256_v15 = vsel %vm178_vm3, %v2253_v35, %v2255_v2  ;;  %v2263_v39 = vsel %vm178_vm3, %v2255_v2, %v4233_v5 }
 0x186   :  { %v2412_v58 = vrot.slane %v2396_v36, 3  ;;  %v2350_v63 = vrot.slane %v2256_v15, 4  ;;  %v2351_v49 = vrot.slane %v2263_v39, 4  ;;  %v2413_v6 = vrot.slane %v2397_v56, 3  ;;  %v526_v19 = vpop.f32.mrf.mxu1 }
 0x187   :  { %v2382_v25 = vsel %vm301_vm6, %v2374_v28, %v2326_v32  ;;  %v2383_v51 = vsel %vm301_vm6, %v2375_v9, %v2327_v44 }
 0x188   :  { %v2390_v41 = vsel %vm310_vm7, %v2382_v25, %v2350_v63  ;;  %v2391_v47 = vsel %vm310_vm7, %v2383_v51, %v2351_v49  ;;  %3027 = vmatprep.subr.msk.mxu0 %vm292_vm4, %v2413_v6  ;;  %v2429_v30 = vsel %vm351_vm8, %v2389_v27, %v2413_v6  ;;  %v2428_v43 = vsel %vm351_vm8, %v2388_v34, %v2412_v58 }
 0x189   :  { %v2398_v38 = vmul.f32 %v2390_v41, %v2390_v41  ;;  %v2399_v61 = vmul.f32 %v2391_v47, %v2391_v47  ;;  %3028 = vmatpush1.msk.msra.mxu0 %vm292_vm4, %v2412_v58 }
 0x18a   :  { %2632 = vmatprep.subr.mxu0 %v2429_v30 }
 0x18b   :  { %v2414_v5 = vrot.slane %v2398_v38, 3  ;;  %2633 = vmatpush1.msra.mxu0 %v2428_v43  ;;  %v2415_v52 = vrot.slane %v2399_v61, 3 }
 0x18c   :  { %3029 = vmatmul.mubr.msk.f32.vlgmr.msra.gmra.mxu0 %vm367_vm9, %v4267_v37  ;;  %3036 = vmatprep.subr.mxu0 %v3148_v20 }
 0x18d   :  { %3030 = vmatprep.subr.msk.mxu1 %vm292_vm4, %v2415_v52  ;;  %v2431_v31 = vsel %vm351_vm8, %v2391_v47, %v2415_v52  ;;  %v2430_v11 = vsel %vm351_vm8, %v2390_v41, %v2414_v5 }
 0x18e   :  { %3031 = vmatpush1.msk.msra.mxu1 %vm292_vm4, %v2414_v5  ;;  %v595_v29 = vpop.f32.mrf.mxu0 }
 0x18f   :  { %2703 = vmatprep.subr.mxu1 %v2431_v31 }
 0x190   :  { %2704 = vmatpush1.msra.mxu1 %v2430_v11  ;;  %v4375_v17 = vpop.permute.xlu1 %1056 }
 0x191   :  { %3032 = vmatmul.mubr.msk.f32.vlgmr.msra.gmra.mxu1 %vm367_vm9, %v4267_v37  ;;  %v365_v46 = vpop.permute.xlu0 %364  ;;  %v597_v37 = vpop.f32.mrf.mxu0 }
 0x192   :  { %v525_v33 = vadd.f32 %v524_v42, %v365_v46  ;;  %v454_v60 = vadd.f32 %v453_v40, %v365_v46  ;;  %v527_v0 = vadd.f32 %v526_v19, %v365_v46  ;;  %v456_v14 = vadd.f32 %v455_v55, %v365_v46 }
 0x193   :  { %v596_v12 = vadd.f32 %v595_v29, %v365_v46  ;;  %v598_v62 = vadd.f32 %v597_v37, %v365_v46 }
 0x194   :  { %v4360_v45 = vmax.f32 %v525_v33, 0.0  ;;  %v4362_v4 = vmax.f32 %v454_v60, 0.0  ;;  %v4364_v59 = vmax.f32 %v527_v0, 0.0  ;;  %v4367_v24 = vmax.f32 %v456_v14, 0.0  ;;  %v4410_v41 = vpop.permute.xlu1 %1747 }
 0x195   :  { %v4369_v16 = vmax.f32 %v596_v12, 0.0  ;;  %v4377_v54 = vmax.f32 %v598_v62, 0.0 }
 0x196   :  { %3053 = vrsqrt.f32 %v4360_v45  ;;  %v666_v50 = vpop.f32.mrf.mxu1  ;;  %vm695_vm10 = vcmp.eq.f32.partialorder %v4360_v45, inf  ;;  %vm681_vm11 = vcmp.eq.f32.partialorder %v4362_v4, inf  ;;  %v698_v58 = vand.u32 2147483648, %v4360_v45 }
 0x197   :  { %3055 = vrsqrt.f32 %v4362_v4  ;;  %v667_v26 = vadd.f32 %v666_v50, %v365_v46  ;;  %vm702_vm12 = vcmp.eq.f32.partialorder %v4364_v59, inf  ;;  %v684_v49 = vand.u32 2147483648, %v4362_v4 }
 0x198   :  { %3057 = vrsqrt.f32 %v4364_v59  ;;  %v668_v35 = vpop.f32.mrf.mxu1  ;;  %vm697_vm13 = vcmp.eq.f32.partialorder %v4360_v45, 0.0  ;;  %vm688_vm14 = vcmp.eq.f32.partialorder %v4367_v24, inf  ;;  %vm683_vm15 = vcmp.eq.f32.partialorder %v4362_v4, 0.0 }
 0x199   :  { %3059 = vrsqrt.f32 %v4367_v24  ;;  %v669_v3 = vadd.f32 %v668_v35, %v365_v46  ;;  %v4381_v53 = vmax.f32 %v667_v26, 0.0  ;;  %vm704_vm0 = vcmp.eq.f32.partialorder %v4364_v59, 0.0 }
 0x19a   :  { %3061 = vrsqrt.f32 %v4369_v16  ;;  %v705_v52 = vand.u32 2147483648, %v4364_v59  ;;  %vm709_vm1 = vcmp.eq.f32.partialorder %v4369_v16, inf  ;;  %v691_v40 = vand.u32 2147483648, %v4367_v24 }
 0x19b   :  { %3063 = vrsqrt.f32 %v4377_v54  ;;  %v4389_v8 = vmax.f32 %v669_v3, 0.0  ;;  %vm690_vm2 = vcmp.eq.f32.partialorder %v4367_v24, 0.0  ;;  %v712_v55 = vand.u32 2147483648, %v4369_v16 }
 0x19c   :  { %3065 = vrsqrt.f32 %v4381_v53  ;;  %vm711_vm3 = vcmp.eq.f32.partialorder %v4369_v16, 0.0  ;;  %vm716_vm4 = vcmp.eq.f32.partialorder %v4377_v54, inf  ;;  %vm718_vm5 = vcmp.eq.f32.partialorder %v4377_v54, 0.0 }
 0x19d   :  { %v719_v26 = vand.u32 2147483648, %v4377_v54  ;;  %vm723_vm8 = vcmp.eq.f32.partialorder %v4381_v53, inf }
 0x1a3   :  { %v3054_v23 = vpop.eup %3053 }
 0x1a4   :  { %v3056_v34 = vpop.eup %3055  ;;  %v694_v36 = vmul.f32 %v3054_v23, %v4360_v45 }
 0x1a5   :  { %v3058_v56 = vpop.eup %3057  ;;  %v680_v44 = vmul.f32 %v3056_v34, %v4362_v4 }
 0x1a6   :  { %v3060_v22 = vpop.eup %3059  ;;  %v696_v6 = vsel %vm695_vm10, %v4360_v45, %v694_v36  ;;  %v701_v25 = vmul.f32 %v3058_v56, %v4364_v59 }
 0x1a7   :  { %v3062_v15 = vpop.eup %3061  ;;  %v687_v47 = vmul.f32 %v3060_v22, %v4367_v24  ;;  %v682_v61 = vsel %vm681_vm11, %v4362_v4, %v680_v44  ;;  %v4447_v37 = vsel %vm697_vm13, %v698_v58, %v696_v6  ;;  %vm725_vm11 = vcmp.eq.f32.partialorder %v4381_v53, 0.0  ;;  %v4498_v6 = vpop.permute.xlu0 %2438 }
 0x1a8   :  { %v708_v43 = vmul.f32 %v3062_v15, %v4369_v16  ;;  %v703_v11 = vsel %vm702_vm12, %v4364_v59, %v701_v25  ;;  %v3064_v46 = vpop.eup %3063  ;;  %v4443_v12 = vsel %vm683_vm15, %v684_v49, %v682_v61  ;;  %v726_v15 = vand.u32 2147483648, %v4381_v53 }
 0x1a9   :  { %v689_v33 = vsel %vm688_vm14, %v4367_v24, %v687_v47  ;;  %v4453_v50 = vsel %vm704_vm0, %v705_v52, %v703_v11  ;;  %vm730_vm12 = vcmp.eq.f32.partialorder %v4389_v8, inf  ;;  %vm732_vm13 = vcmp.eq.f32.partialorder %v4389_v8, 0.0 }
 0x1aa   :  { %v710_v0 = vsel %vm709_vm1, %v4369_v16, %v708_v43  ;;  %v4455_v62 = vsel %vm690_vm2, %v691_v40, %v689_v33  ;;  %v715_v16 = vmul.f32 %v3064_v46, %v4377_v54 }
 0x1ab   :  { %v4459_v4 = vsel %vm711_vm3, %v712_v55, %v710_v0 }
 0x1ac   :  { %v717_v23 = vsel %vm716_vm4, %v4377_v54, %v715_v16 }
 0x1ad   :  { %v4488_v44 = vsel %vm718_vm5, %v719_v26, %v717_v23 }
 0x1b8   :  { %v1144_v18 = vpop.f32.mrf.mxu0 }
 0x1b9   :  { %v1145_v10 = vadd.f32 %v1144_v18, %v4375_v17  ;;  %v3066_v18 = vpop.eup %3065 }
 0x1ba   :  { %v1146_v21 = vpop.f32.mrf.mxu0 }
 0x1bb   :  { %v1147_v13 = vadd.f32 %v1146_v21, %v4375_v17  ;;  %v4385_v7 = vmax.f32 %v1145_v10, 0.0 }
 0x1bd   :  { %v4387_v9 = vmax.f32 %v1147_v13, 0.0  ;;  %3067 = vrsqrt.f32 %v4385_v7  ;;  %vm1372_vm6 = vcmp.eq.f32.partialorder %v4385_v7, inf  ;;  %vm1374_vm7 = vcmp.eq.f32.partialorder %v4385_v7, 0.0 }
 0x1bf   :  { %3069 = vrsqrt.f32 %v4387_v9  ;;  %vm1379_vm9 = vcmp.eq.f32.partialorder %v4387_v9, inf  ;;  %vm1381_vm10 = vcmp.eq.f32.partialorder %v4387_v9, 0.0 }
 0x1c0   :  { %3071 = vrsqrt.f32 %v4389_v8 }
 0x1c2   :  { %v1215_v48 = vpop.f32.mrf.mxu1 }
 0x1c3   :  { %v1216_v57 = vadd.f32 %v1215_v48, %v4375_v17  ;;  %v1375_v48 = vand.u32 2147483648, %v4385_v7 }
 0x1c4   :  { %v1217_v27 = vpop.f32.mrf.mxu1 }
 0x1c5   :  { %v1218_v2 = vadd.f32 %v1217_v27, %v4375_v17  ;;  %v4394_v1 = vmax.f32 %v1216_v57, 0.0  ;;  %v722_v57 = vmul.f32 %v3066_v18, %v4381_v53 }
 0x1c7   :  { %v4404_v63 = vmax.f32 %v1218_v2, 0.0  ;;  %3073 = vrsqrt.f32 %v4394_v1  ;;  %v724_v58 = vsel %vm723_vm8, %v4381_v53, %v722_v57  ;;  %vm1386_vm14 = vcmp.eq.f32.partialorder %v4394_v1, inf }
 0x1c8   :  { %vm1388_vm15 = vcmp.eq.f32.partialorder %v4394_v1, 0.0  ;;  %v4516_v43 = vsel %vm725_vm11, %v726_v15, %v724_v58  ;;  %v1389_v11 = vand.u32 2147483648, %v4394_v1 }
 0x1c9   :  { %3075 = vrsqrt.f32 %v4404_v63  ;;  %vm1393_vm0 = vcmp.eq.f32.partialorder %v4404_v63, inf  ;;  %vm1395_vm1 = vcmp.eq.f32.partialorder %v4404_v63, 0.0 }
 0x1ca   :  { %v3068_v45 = vpop.eup %3067 }
 0x1cb   :  { %v1371_v27 = vmul.f32 %v3068_v45, %v4385_v7 }
 0x1cc   :  { %v3070_v21 = vpop.eup %3069 }
 0x1cd   :  { %v3072_v3 = vpop.eup %3071  ;;  %v1378_v22 = vmul.f32 %v3070_v21, %v4387_v9  ;;  %v1373_v25 = vsel %vm1372_vm6, %v4385_v7, %v1371_v27 }
 0x1ce   :  { %v1286_v28 = vpop.f32.mrf.mxu0 }
 0x1cf   :  { %v1287_v51 = vadd.f32 %v1286_v28, %v4375_v17 }
 0x1d0   :  { %v1288_v32 = vpop.f32.mrf.mxu0 }
 0x1d1   :  { %v1289_v30 = vadd.f32 %v1288_v32, %v4375_v17  ;;  %v4431_v42 = vmax.f32 %v1287_v51, 0.0  ;;  %v1382_v32 = vand.u32 2147483648, %v4387_v9 }
 0x1d3   :  { %v4436_v60 = vmax.f32 %v1289_v30, 0.0  ;;  %3077 = vrsqrt.f32 %v4431_v42  ;;  %vm1400_vm2 = vcmp.eq.f32.partialorder %v4431_v42, inf  ;;  %vm1402_vm3 = vcmp.eq.f32.partialorder %v4431_v42, 0.0 }
 0x1d4   :  { %v3074_v2 = vpop.eup %3073 }
 0x1d5   :  { %v1357_v39 = vpop.f32.mrf.mxu1  ;;  %3079 = vrsqrt.f32 %v4436_v60  ;;  %v1385_v51 = vmul.f32 %v3074_v2, %v4394_v1  ;;  %vm1407_vm4 = vcmp.eq.f32.partialorder %v4436_v60, inf  ;;  %vm1409_vm5 = vcmp.eq.f32.partialorder %v4436_v60, 0.0 }
 0x1d6   :  { %v1358_v29 = vadd.f32 %v1357_v39, %v4375_v17  ;;  %v729_v39 = vmul.f32 %v3072_v3, %v4389_v8  ;;  %v3076_v49 = vpop.eup %3075  ;;  %v1403_v3 = vand.u32 2147483648, %v4431_v42 }
 0x1d7   :  { %v4419_v5 = vpop.f32.mrf.mxu1  ;;  %v1392_v40 = vmul.f32 %v3076_v49, %v4404_v63  ;;  %v1387_v33 = vsel %vm1386_vm14, %v4394_v1, %v1385_v51 }
 0x1d8   :  { %v4467_v10 = vmax.f32 %v1358_v29, 0.0  ;;  %v1360_v47 = vadd.f32 %v4419_v5, %v4375_v17  ;;  %v731_v52 = vsel %vm730_vm12, %v4389_v8, %v729_v39  ;;  %v733_v17 = vand.u32 2147483648, %v4389_v8 }
 0x1da   :  { %v4534_v0 = vmax.f32 %v1360_v47, 0.0  ;;  %v1417_v58 = vand.u32 2147483648, %v4467_v10 }
 0x1f7   :  { %v1835_v38 = vpop.f32.mrf.mxu0 }
 0x1f8   :  { %v1836_v31 = vadd.f32 %v1835_v38, %v4410_v41  ;;  %v1380_v38 = vsel %vm1379_vm9, %v4387_v9, %v1378_v22  ;;  %v4547_v9 = vsel %vm732_vm13, %v733_v17, %v731_v52  ;;  %vm1416_vm9 = vcmp.eq.f32.partialorder %v4467_v10, 0.0 }
 0x1f9   :  { %v1837_v19 = vpop.f32.mrf.mxu0  ;;  %v1383_v55 = vsel %vm1381_vm10, %v1382_v32, %v1380_v38 }
 0x1fa   :  { %v4449_v24 = vmax.f32 %v1836_v31, 0.0  ;;  %v1838_v35 = vadd.f32 %v1837_v19, %v4410_v41  ;;  %v1376_v31 = vsel %vm1374_vm7, %v1375_v48, %v1373_v25  ;;  %v3078_v19 = vpop.eup %3077  ;;  %v4554_v26 = vadd.f32 %v1383_v55, %v4455_v62 }
 0x1fb   :  { %v3080_v16 = vpop.eup %3079  ;;  %v4541_v18 = vadd.f32 %v1376_v31, %v4443_v12  ;;  %v1399_v48 = vmul.f32 %v3078_v19, %v4431_v42  ;;  %vm1414_vm7 = vcmp.eq.f32.partialorder %v4467_v10, inf }
 0x1fc   :  { %3081 = vrsqrt.f32 %v4449_v24  ;;  %v4476_v28 = vmax.f32 %v1838_v35, 0.0  ;;  %v1396_v35 = vand.u32 2147483648, %v4404_v63  ;;  %v1406_v23 = vmul.f32 %v3080_v16, %v4436_v60 }
 0x1fd   :  { %3083 = vrsqrt.f32 %v4467_v10  ;;  %vm2063_vm6 = vcmp.eq.f32.partialorder %v4449_v24, inf  ;;  %vm2065_vm8 = vcmp.eq.f32.partialorder %v4449_v24, 0.0 }
 0x1fe   :  { %3085 = vrsqrt.f32 %v4476_v28  ;;  %v1408_v39 = vsel %vm1407_vm4, %v4436_v60, %v1406_v23  ;;  %vm2070_vm10 = vcmp.eq.f32.partialorder %v4476_v28, inf  ;;  %vm2072_vm12 = vcmp.eq.f32.partialorder %v4476_v28, 0.0 }
 0x200   :  { %v1906_v14 = vpop.f32.mrf.mxu1 }
 0x201   :  { %v1907_v59 = vadd.f32 %v1906_v14, %v4410_v41 }
 0x202   :  { %v1908_v13 = vpop.f32.mrf.mxu1 }
 0x203   :  { %v1909_v36 = vadd.f32 %v1908_v13, %v4410_v41  ;;  %v4482_v56 = vmax.f32 %v1907_v59, 0.0  ;;  %v1394_v59 = vsel %vm1393_vm0, %v4404_v63, %v1392_v40  ;;  %v1390_v13 = vsel %vm1388_vm15, %v1389_v11, %v1387_v33 }
 0x204   :  { %v1397_v62 = vsel %vm1395_vm1, %v1396_v35, %v1394_v59  ;;  %v4574_v2 = vadd.f32 %v1390_v13, %v4447_v37  ;;  %v1401_v37 = vsel %vm1400_vm2, %v4431_v42, %v1399_v48 }
 0x205   :  { %v4507_v30 = vmax.f32 %v1909_v36, 0.0  ;;  %3087 = vrsqrt.f32 %v4482_v56  ;;  %v1410_v36 = vand.u32 2147483648, %v4436_v60  ;;  %v4582_v15 = vadd.f32 %v1397_v62, %v4453_v50 }
 0x206   :  { %v4611_v11 = vsel %vm1402_vm3, %v1403_v3, %v1401_v37  ;;  %vm2077_vm11 = vcmp.eq.f32.partialorder %v4482_v56, inf  ;;  %v2073_v60 = vand.u32 2147483648, %v4476_v28  ;;  %vm2079_vm13 = vcmp.eq.f32.partialorder %v4482_v56, 0.0 }
 0x207   :  { %3089 = vrsqrt.f32 %v4507_v30  ;;  %v4615_v40 = vsel %vm1409_vm5, %v1410_v36, %v1408_v39  ;;  %v2080_v19 = vand.u32 2147483648, %v4482_v56  ;;  %vm2084_vm14 = vcmp.eq.f32.partialorder %v4507_v30, inf }
 0x208   :  { %v2087_v13 = vand.u32 2147483648, %v4507_v30  ;;  %vm2086_vm1 = vcmp.eq.f32.partialorder %v4507_v30, 0.0  ;;  %vm1421_vm3 = vcmp.eq.f32.partialorder %v4534_v0, inf }
 0x209   :  { %v3082_v21 = vpop.eup %3081 }
 0x20a   :  { %v3084_v1 = vpop.eup %3083  ;;  %v2062_v27 = vmul.f32 %v3082_v21, %v4449_v24 }
 0x20b   :  { %v3086_v22 = vpop.eup %3085  ;;  %v1413_v50 = vmul.f32 %v3084_v1, %v4467_v10  ;;  %v4654_v1 = vld [vmem:[%s4797_s3] sm:$0xff] }
 0x20c   :  { %v1977_v34 = vpop.f32.mrf.mxu0  ;;  %v2064_v38 = vsel %vm2063_vm6, %v4449_v24, %v2062_v27 }
 0x20d   :  { %v1978_v46 = vadd.f32 %v1977_v34, %v4410_v41 }
 0x20e   :  { %v1979_v54 = vpop.f32.mrf.mxu0 }
 0x20f   :  { %v4556_v12 = vmax.f32 %v1978_v46, 0.0  ;;  %v1980_v57 = vadd.f32 %v1979_v54, %v4410_v41 }
 0x211   :  { %v4597_v47 = vmax.f32 %v1980_v57, 0.0  ;;  %vm2091_vm2 = vcmp.eq.f32.partialorder %v4556_v12, inf }
 0x212   :  { %v3088_v49 = vpop.eup %3087 }
 0x213   :  { %v2076_v31 = vmul.f32 %v3088_v49, %v4482_v56 }
 0x214   :  { %v2048_v7 = vpop.f32.mrf.mxu1  ;;  %v3090_v46 = vpop.eup %3089 }
 0x215   :  { %v2049_v51 = vadd.f32 %v2048_v7, %v4410_v41  ;;  %v2078_v16 = vsel %vm2077_vm11, %v4482_v56, %v2076_v31  ;;  %vm2098_vm11 = vcmp.eq.f32.partialorder %v4597_v47, inf }
 0x216   :  { %v2050_v8 = vpop.f32.mrf.mxu1  ;;  %v2081_v57 = vsel %vm2079_vm13, %v2080_v19, %v2078_v16  ;;  %vm2100_vm13 = vcmp.eq.f32.partialorder %v4597_v47, 0.0 }
 0x217   :  { %v2051_v52 = vadd.f32 %v2050_v8, %v4410_v41  ;;  %v1415_v41 = vsel %vm1414_vm7, %v4467_v10, %v1413_v50  ;;  %v2119_v39 = vadd.f32 %v2081_v57, %v4574_v2  ;;  %vm1423_vm7 = vcmp.eq.f32.partialorder %v4534_v0, 0.0 }
 0x218   :  { %v1418_v56 = vsel %vm1416_vm9, %v1417_v58, %v1415_v41 }
 0x219   :  { %v4629_v55 = vmax.f32 %v2051_v52, 0.0 }
 0x237   :  { %v2526_v61 = vpop.f32.mrf.mxu0 }
 0x238   :  { %v2527_v5 = vadd.f32 %v2526_v61, %v4498_v6  ;;  %v2066_v61 = vand.u32 2147483648, %v4449_v24  ;;  %v2083_v24 = vmul.f32 %v3090_v46, %v4507_v30 }
 0x239   :  { %v2528_v53 = vpop.f32.mrf.mxu0 }
 0x23a   :  { %v4536_v29 = vmax.f32 %v2527_v5, 0.0  ;;  %v2529_v14 = vadd.f32 %v2528_v53, %v4498_v6  ;;  %v2069_v5 = vmul.f32 %v3086_v22, %v4476_v28  ;;  %v4623_v53 = vmax.f32 %v2049_v51, 0.0 }
 0x23b   :  { %v2067_v42 = vsel %vm2065_vm8, %v2066_v61, %v2064_v38 }
 0x23c   :  { %3091 = vrsqrt.f32 %v4536_v29  ;;  %v4550_v45 = vmax.f32 %v2529_v14, 0.0  ;;  %v2071_v7 = vsel %vm2070_vm10, %v4476_v28, %v2069_v5  ;;  %v2117_v59 = vadd.f32 %v2067_v42, %v4541_v18 }
 0x23d   :  { %3093 = vrsqrt.f32 %v4534_v0  ;;  %vm2754_vm15 = vcmp.eq.f32.partialorder %v4536_v29, inf  ;;  %v2757_v21 = vand.u32 2147483648, %v4536_v29  ;;  %vm2756_vm0 = vcmp.eq.f32.partialorder %v4536_v29, 0.0 }
 0x23e   :  { %3095 = vrsqrt.f32 %v4550_v45  ;;  %v2074_v23 = vsel %vm2072_vm12, %v2073_v60, %v2071_v7  ;;  %v2085_v28 = vsel %vm2084_vm14, %v4507_v30, %v2083_v24  ;;  %vm2761_vm4 = vcmp.eq.f32.partialorder %v4550_v45, inf }
 0x23f   :  { %3097 = vrsqrt.f32 %v4556_v12  ;;  %v2118_v30 = vadd.f32 %v2074_v23, %v4554_v26  ;;  %v2088_v50 = vsel %vm2086_vm1, %v2087_v13, %v2085_v28  ;;  %vm2763_vm5 = vcmp.eq.f32.partialorder %v4550_v45, 0.0 }
 0x240   :  { %v2597_v34 = vpop.f32.mrf.mxu1  ;;  %v2764_v26 = vand.u32 2147483648, %v4550_v45  ;;  %v2120_v16 = vadd.f32 %v2088_v50, %v4582_v15  ;;  %v1430_v15 = vadd.f32 %v4611_v11, %v4459_v4  ;;  %vm2093_vm12 = vcmp.eq.f32.partialorder %v4556_v12, 0.0 }
 0x241   :  { %v2598_v63 = vadd.f32 %v2597_v34, %v4498_v6  ;;  %vm2105_vm14 = vcmp.eq.f32.partialorder %v4623_v53, inf  ;;  %vm2114_vm1 = vcmp.eq.f32.partialorder %v4629_v55, 0.0 }
 0x242   :  { %v2599_v32 = vpop.f32.mrf.mxu1 }
 0x243   :  { %v4591_v54 = vmax.f32 %v2598_v63, 0.0  ;;  %v2600_v25 = vadd.f32 %v2599_v32, %v4498_v6 }
 0x245   :  { %3099 = vrsqrt.f32 %v4591_v54  ;;  %v4604_v17 = vmax.f32 %v2600_v25, 0.0  ;;  %vm2768_vm6 = vcmp.eq.f32.partialorder %v4591_v54, inf  ;;  %vm2770_vm8 = vcmp.eq.f32.partialorder %v4591_v54, 0.0 }
 0x246   :  { %v2771_v46 = vand.u32 2147483648, %v4591_v54 }
 0x247   :  { %3101 = vrsqrt.f32 %v4604_v17  ;;  %vm2775_vm9 = vcmp.eq.f32.partialorder %v4604_v17, inf  ;;  %vm2777_vm10 = vcmp.eq.f32.partialorder %v4604_v17, 0.0 }
 0x248   :  { %3103 = vrsqrt.f32 %v4597_v47 }
 0x249   :  { %v3092_v33 = vpop.eup %3091  ;;  %3105 = vrsqrt.f32 %v4623_v53 }
 0x24a   :  { %v2753_v14 = vmul.f32 %v3092_v33, %v4536_v29  ;;  %v3094_v35 = vpop.eup %3093  ;;  %3107 = vrsqrt.f32 %v4629_v55  ;;  %v2778_v33 = vand.u32 2147483648, %v4604_v17 }
 0x24b   :  { %v3096_v8 = vpop.eup %3095 }
 0x24c   :  { %v2668_v48 = vpop.f32.mrf.mxu0  ;;  %v2755_v3 = vsel %vm2754_vm15, %v4536_v29, %v2753_v14  ;;  %v3098_v34 = vpop.eup %3097  ;;  %v4663_v29 = vmul.f32 %v3094_v35, %v4534_v0  ;;  %v2760_v32 = vmul.f32 %v3096_v8, %v4550_v45  ;;  %v2094_v35 = vand.u32 2147483648, %v4556_v12 }
 0x24d   :  { %v2669_v18 = vadd.f32 %v2668_v48, %v4498_v6  ;;  %v2758_v62 = vsel %vm2756_vm0, %v2757_v21, %v2755_v3  ;;  %v2090_v51 = vmul.f32 %v3098_v34, %v4556_v12  ;;  %v1424_v3 = vand.u32 2147483648, %v4534_v0 }
 0x24e   :  { %v2670_v27 = vpop.f32.mrf.mxu0  ;;  %v2808_v36 = vadd.f32 %v2758_v62, %v2117_v59  ;;  %v2762_v61 = vsel %vm2761_vm4, %v4550_v45, %v2760_v32  ;;  %v2101_v62 = vand.u32 2147483648, %v4597_v47  ;;  %v1422_v4 = vsel %vm1421_vm3, %v4534_v0, %v4663_v29 }
 0x24f   :  { %v4665_v63 = vmax.f32 %v2669_v18, 0.0  ;;  %v2671_v22 = vadd.f32 %v2670_v27, %v4498_v6  ;;  %v1431_v18 = vadd.f32 %v4615_v40, %v4488_v44  ;;  %vm2107_vm15 = vcmp.eq.f32.partialorder %v4623_v53, 0.0 }
 0x250   :  { %v2817_v37 = vadd.f32 %v4654_v1, %v2808_v36  ;;  %v2108_v36 = vand.u32 2147483648, %v4623_v53  ;;  %vm2112_vm0 = vcmp.eq.f32.partialorder %v4629_v55, inf  ;;  %v2115_v29 = vand.u32 2147483648, %v4629_v55 }
 0x251   :  { %3109 = vrsqrt.f32 %v4665_v63  ;;  %v4679_v49 = vmax.f32 %v2671_v22, 0.0  ;;  %v2739_v25 = vpop.f32.mrf.mxu1  ;;  %vm2784_vm3 = vcmp.eq.f32.partialorder %v4665_v63, 0.0 }
 0x252   :  { %v3100_v10 = vpop.eup %3099  ;;  %v2740_v58 = vadd.f32 %v2739_v25, %v4498_v6  ;;  %2818 = vmin.xlane.f32.xlu1 %v2817_v37 }
 0x253   :  { %3111 = vrsqrt.f32 %v4679_v49  ;;  %v2741_v2 = vpop.f32.mrf.mxu1  ;;  %v2767_v38 = vmul.f32 %v3100_v10, %v4591_v54  ;;  %vm2789_vm4 = vcmp.eq.f32.partialorder %v4679_v49, inf }
 0x254   :  { %v3102_v52 = vpop.eup %3101  ;;  %v4691_v5 = vmax.f32 %v2740_v58, 0.0  ;;  %v2742_v31 = vadd.f32 %v2741_v2, %v4498_v6  ;;  %v2765_v6 = vsel %vm2763_vm5, %v2764_v26, %v2762_v61  ;;  %vm2791_vm5 = vcmp.eq.f32.partialorder %v4679_v49, 0.0 }
 0x255   :  { %v3104_v41 = vpop.eup %3103  ;;  %v2769_v42 = vsel %vm2768_vm6, %v4591_v54, %v2767_v38  ;;  %v2774_v60 = vmul.f32 %v3102_v52, %v4604_v17  ;;  %v2809_v45 = vadd.f32 %v2765_v6, %v2118_v30 }
 0x256   :  { %3113 = vrsqrt.f32 %v4691_v5  ;;  %v4701_v19 = vmax.f32 %v2742_v31, 0.0  ;;  %v2772_v7 = vsel %vm2770_vm8, %v2771_v46, %v2769_v42  ;;  %v2097_v59 = vmul.f32 %v3104_v41, %v4597_v47  ;;  %v3106_v21 = vpop.eup %3105 }
 0x257   :  { %v2810_v14 = vadd.f32 %v2772_v7, %v2119_v39  ;;  %v2776_v24 = vsel %vm2775_vm9, %v4604_v17, %v2774_v60  ;;  %v3108_v48 = vpop.eup %3107  ;;  %v2092_v17 = vsel %vm2091_vm2, %v4556_v12, %v2090_v51  ;;  %v1432_v12 = vadd.f32 %v1418_v56, %v4516_v43 }
 0x258   :  { %3115 = vrsqrt.f32 %v4701_v19  ;;  %v2779_v54 = vsel %vm2777_vm10, %v2778_v33, %v2776_v24  ;;  %v2099_v11 = vsel %vm2098_vm11, %v4597_v47, %v2097_v59  ;;  %v2104_v57 = vmul.f32 %v3106_v21, %v4623_v53  ;;  %v2878_v59 = vld [vmem:[%s4798_s4] sm:$0xff] }
 0x259   :  { %v2823_v13 = vadd.f32 %v4654_v1, %v2810_v14  ;;  %v2811_v8 = vadd.f32 %v2779_v54, %v2120_v16  ;;  %v2820_v34 = vadd.f32 %v4654_v1, %v2809_v45  ;;  %v2095_v27 = vsel %vm2093_vm12, %v2094_v35, %v2092_v17  ;;  %v2885_v35 = vld [vmem:[%s4799_s5] sm:$0xff] }
 0x25a   :  { %v2111_v44 = vmul.f32 %v3108_v48, %v4629_v55  ;;  %v1425_v47 = vsel %vm1423_vm7, %v1424_v3, %v1422_v4  ;;  %v2102_v28 = vsel %vm2100_vm13, %v2101_v62, %v2099_v11  ;;  %v2121_v32 = vadd.f32 %v2095_v27, %v1430_v15 }
 0x25b   :  { %2824 = vmin.xlane.f32.xlu0 %v2823_v13  ;;  %v2826_v23 = vadd.f32 %v4654_v1, %v2811_v8  ;;  %vm2782_vm2 = vcmp.eq.f32.partialorder %v4665_v63, inf  ;;  %v2785_v56 = vand.u32 2147483648, %v4665_v63  ;;  %v2106_v0 = vsel %vm2105_vm14, %v4623_v53, %v2104_v57 }
 0x25c   :  { %v2113_v30 = vsel %vm2112_vm0, %v4629_v55, %v2111_v44  ;;  %v2122_v50 = vadd.f32 %v2102_v28, %v1431_v18  ;;  %v2792_v51 = vand.u32 2147483648, %v4679_v49  ;;  %v2109_v2 = vsel %vm2107_vm15, %v2108_v36, %v2106_v0 }
 0x25d   :  { %2827 = vmin.xlane.f32.xlu1 %v2826_v23  ;;  %v1433_v61 = vadd.f32 %v1425_v47, %v4547_v9  ;;  %v2116_v52 = vsel %vm2114_vm1, %v2115_v29, %v2113_v30  ;;  %vm2796_vm6 = vcmp.eq.f32.partialorder %v4691_v5, inf  ;;  %v2799_v42 = vand.u32 2147483648, %v4691_v5 }
 0x25e   :  { %v3110_v40 = vpop.eup %3109  ;;  %vm2798_vm7 = vcmp.eq.f32.partialorder %v4691_v5, 0.0  ;;  %vm2803_vm8 = vcmp.eq.f32.partialorder %v4701_v19, inf  ;;  %v2806_v33 = vand.u32 2147483648, %v4701_v19  ;;  %vm2805_vm9 = vcmp.eq.f32.partialorder %v4701_v19, 0.0 }
 0x25f   :  { %2821 = vmin.xlane.f32.xlu0 %v2820_v34  ;;  %v2781_v43 = vmul.f32 %v3110_v40, %v4665_v63  ;;  %v2124_v6 = vadd.f32 %v2116_v52, %v1433_v61  ;;  %vm3150_vm10 = vmmov 0   ;;  %vm2841_vm11 = vcmask 7168  }
 0x260   :  { %v3112_v22 = vpop.eup %3111  ;;  %3038 = vmatprep.mubr.msk.f32.mxu0 %vm3150_vm10, %v3148_v20  ;;  %vm2843_vm12 = vcmask 15360   ;;  %vm2845_vm13 = vcmask 23552   ;;  %vm2847_vm14 = vcmask 31744   ;;  %vm2849_vm15 = vcmask 39936  }
 0x261   :  { %v2783_v37 = vsel %vm2782_vm2, %v4665_v63, %v2781_v43  ;;  %v2788_v39 = vmul.f32 %v3112_v22, %v4679_v49  ;;  %vm2851_vm0 = vcmask 48128   ;;  %vm2853_vm1 = vcmask 56320  }
 0x262   :  { %v2786_v25 = vsel %vm2784_vm3, %v2785_v56, %v2783_v37  ;;  %vm2855_vm2 = vcmask 64512   ;;  %vm2972_vm3 = vcmask 59392  }
 0x263   :  { %v3114_v10 = vpop.eup %3113  ;;  %v2812_v58 = vadd.f32 %v2786_v25, %v2121_v32  ;;  %v2790_v26 = vsel %vm2789_vm4, %v4679_v49, %v2788_v39  ;;  %v2123_v49 = vadd.f32 %v2109_v2, %v1432_v12 }
 0x264   :  { %v2793_v63 = vsel %vm2791_vm5, %v2792_v51, %v2790_v26  ;;  %v2795_v38 = vmul.f32 %v3114_v10, %v4691_v5 }
 0x265   :  { %v3116_v31 = vpop.eup %3115  ;;  %v2829_v46 = vadd.f32 %v4654_v1, %v2812_v58  ;;  %v2813_v41 = vadd.f32 %v2793_v63, %v2122_v50  ;;  %v2892_v63 = vld [vmem:[%s4800_s6] sm:$0x7] }
 0x266   :  { %v2797_v53 = vsel %vm2796_vm6, %v4691_v5, %v2795_v38  ;;  %v2802_v60 = vmul.f32 %v3116_v31, %v4701_v19 }
 0x267   :  { %2830 = vmin.xlane.f32.xlu0 %v2829_v46  ;;  %v2832_v9 = vadd.f32 %v4654_v1, %v2813_v41  ;;  %v2800_v55 = vsel %vm2798_vm7, %v2799_v42, %v2797_v53 }
 0x268   :  { %v2814_v7 = vadd.f32 %v2800_v55, %v2123_v49  ;;  %v2804_v14 = vsel %vm2803_vm8, %v4701_v19, %v2802_v60  ;;  %v2893_v19 = vld [vmem:[%s4801_s7] sm:$0x7] }
 0x269   :  { %2833 = vmin.xlane.f32.xlu1 %v2832_v9  ;;  %v2807_v16 = vsel %vm2805_vm9, %v2806_v33, %v2804_v14 }
 0x26a   :  { %v2835_v5 = vadd.f32 %v4654_v1, %v2814_v7  ;;  %v2815_v24 = vadd.f32 %v2807_v16, %v2124_v6 }
 0x26c   :  { %2836 = vmin.xlane.f32.xlu0 %v2835_v5  ;;  %v2838_v54 = vadd.f32 %v4654_v1, %v2815_v24 }
 0x26e   :  { %2839 = vmin.xlane.f32.xlu1 %v2838_v54 }
 0x27f   :  { %2888 = vperm.xlu1 %3052, %v2885_v35  }
 0x282   :  { %2881 = vperm.xlu0 %3051, %v2878_v59  }
 0x283   :  { %2896 = vperm.xlu1 %3052, %v2893_v19  }
 0x2db   :  { %v2819_v13 = vpop.xlane.xlu1 %2818 }
 0x2e4   :  { %v2825_v1 = vpop.xlane.xlu0 %2824 }
 0x2e6   :  { %v2828_v45 = vpop.xlane.xlu1 %2827 }
 0x2e8   :  { %v2822_v21 = vpop.xlane.xlu0 %2821 }
 0x2e9   :  { %v2842_v8 = vsel %vm2841_vm11, %v2819_v13, %v2822_v21 }
 0x2ea   :  { %v2844_v48 = vsel %vm2843_vm12, %v2842_v8, %v2825_v1 }
 0x2eb   :  { %v2846_v17 = vsel %vm2845_vm13, %v2844_v48, %v2828_v45 }
 0x2f0   :  { %v2831_v15 = vpop.xlane.xlu0 %2830 }
 0x2f1   :  { %v2848_v3 = vsel %vm2847_vm14, %v2846_v17, %v2831_v15 }
 0x2f2   :  { %v2834_v23 = vpop.xlane.xlu1 %2833 }
 0x2f3   :  { %v2850_v18 = vsel %vm2849_vm15, %v2848_v3, %v2834_v23 }
 0x2f5   :  { %v2837_v62 = vpop.xlane.xlu0 %2836 }
 0x2f6   :  { %v2852_v20 = vsel %vm2851_vm0, %v2850_v18, %v2837_v62 }
 0x2f7   :  { %v2840_v4 = vpop.xlane.xlu1 %2839 }
 0x2f8   :  { %v2854_v11 = vsel %vm2853_vm1, %v2852_v20, %v2840_v4 }
 0x2f9   :  { %v2856_v12 = vsel %vm2855_vm2, %v2854_v11, 0.0 }
 0x2fa   :  { %v2857_v57 = vrot.slane %v2856_v12, 4 }
 0x2fb   :  { %v2889_v26 = vpop.permute.xlu1 %2888 }
 0x2fc   :  { %v2858_v34 = vadd.f32 %v2857_v57, %v2856_v12 }
 0x2fd   :  { %v2882_v10 = vpop.permute.xlu0 %2881 }
 0x2fe   :  { %v2859_v27 = vrot.slane %v2858_v34, 2 }
 0x2ff   :  { %v2897_v38 = vpop.permute.xlu1 %2896 }
 0x300   :  { %v2860_v44 = vadd.f32 %v2859_v27, %v2858_v34 }
 0x302   :  { %v2861_v40 = vrot.slane %v2860_v44, 1 }
 0x304   :  { %v2862_v36 = vadd.f32 %v2861_v40, %v2860_v44 }
 0x306   :  { %v2864_v47 = vmul.f32 0.125, %v2862_v36 }
 0x308   :  { %v2865_v43 = vsub.f32 %v2854_v11, %v2864_v47 }
 0x30a   :  { %v2866_v28 = vmul.f32 %v2865_v43, %v2865_v43 }
 0x30c   :  { %v2867_v29 = vsel %vm2855_vm2, %v2866_v28, 0.0 }
 0x30d   :  { %v2868_v22 = vrot.slane %v2867_v29, 4 }
 0x30f   :  { %v2869_v32 = vadd.f32 %v2868_v22, %v2867_v29 }
 0x311   :  { %v2870_v56 = vrot.slane %v2869_v32, 2 }
 0x313   :  { %v2871_v0 = vadd.f32 %v2870_v56, %v2869_v32 }
 0x315   :  { %v2872_v37 = vrot.slane %v2871_v0, 1 }
 0x317   :  { %v2873_v39 = vadd.f32 %v2872_v37, %v2871_v0 }
 0x319   :  { %v2874_v30 = vmul.f32 0.125, %v2873_v39 }
 0x31b   :  { %v2875_v25 = vadd.f32 1e-05, %v2874_v30 }
 0x31d   :  { %3117 = vrsqrt.f32 %v2875_v25 }
 0x32a   :  { %v3118_v50 = vpop.eup %3117 }
 0x32b   :  { %v2877_v51 = vmul.f32 %v3118_v50, %v2865_v43 }
 0x32d   :  { %v2884_v58 = vmul.f32 %v2882_v10, %v2877_v51 }
 0x32f   :  { %v2891_v2 = vadd.f32 %v2889_v26, %v2884_v58 }
 0x331   :  { %3037 = vmatpush3.msra.mxu0 %v2891_v2 }
 0x332   :  { %3039 = vmatmul.mubr.msk.f32.vlgmr.msra.gmra.mxu0 %vm2855_vm2, %v2892_v63 }
 0x3f2   :  { %v2968_v61 = vpop.f32.mrf.mxu0 }
 0x3f3   :  { %v2969_v52 = vadd.f32 %v2968_v61, %v2897_v38 }
 0x3f4   :  { %v3040_v31 = vpop.f32.mrf.mxu0 }
 0x3f5   :  { %2973 = vst.msk [vmem:[%s4802_s8] sm:$0x7] %vm2972_vm3, %v2969_v52 }
 0x3f6   :  { %2978 = vsyncpa [#allocation3], 1 }

</bundles_post_ra>
